<compile_context>
chip_gen: v7x
topology: tpu7x:2x2x1
jax: 0.10.0
libtpu: 0.0.40
codegen_flags: <defaults>
</compile_context>

<pallas_src>
import functools
import math

import jax
import jax.numpy as jnp
from jax.experimental import pallas as pl
from jax.experimental.pallas import tpu as pltpu


_PARALLEL_1D = pltpu.CompilerParams(dimension_semantics=("parallel",))


# ----------------------------------------------------------------------------
# Kernel 1: sent_vec + pe  ->  LayerNorm  ->  * mask        (TreeInference prologue)
# ----------------------------------------------------------------------------
def _embed_norm_kernel(x_ref, pe_ref, g_ref, b_ref, m_ref, o_ref):
    x = x_ref[0].astype(jnp.float32) + pe_ref[...]                      # (N, D)
    mu = jnp.mean(x, axis=-1, keepdims=True)
    var = jnp.mean(jnp.square(x - mu), axis=-1, keepdims=True)
    y = (x - mu) * jax.lax.rsqrt(var + 1e-6) * g_ref[...] + b_ref[...]  # eps = 1e-6
    o_ref[0] = (y * m_ref[0]).astype(o_ref.dtype)                       # mask (N, 1) broadcast


def embed_norm(x, pe, gamma, beta, maskf3):
    B, N, D = x.shape
    return pl.pallas_call(
        _embed_norm_kernel,
        out_shape=jax.ShapeDtypeStruct((B, N, D), x.dtype),
        grid=(B,),
        in_specs=[
            pl.BlockSpec((1, N, D), lambda b: (b, 0, 0)),
            pl.BlockSpec((N, D), lambda b: (0, 0)),
            pl.BlockSpec((1, D), lambda b: (0, 0)),
            pl.BlockSpec((1, D), lambda b: (0, 0)),
            pl.BlockSpec((1, N, 1), lambda b: (b, 0, 0)),
        ],
        out_specs=pl.BlockSpec((1, N, D), lambda b: (b, 0, 0)),
        compiler_params=_PARALLEL_1D,
    )(x, pe, gamma, beta, maskf3)


# ----------------------------------------------------------------------------
# Kernel 2: StructuredAttention scores + masks + matrix-tree Laplacian
# ----------------------------------------------------------------------------
def _structure_scores_kernel(x_ref, wq_ref, bq_ref, wk_ref, bk_ref, wr_ref, br_ref,
                             padc_ref, padr_ref, at_ref, ll_ref, root_ref, *, scale):
    x = x_ref[0].astype(jnp.float32)                                              # (N, D)
    q = (jnp.dot(x, wq_ref[...], preferred_element_type=jnp.float32) + bq_ref[...]) * scale
    k = jnp.dot(x, wk_ref[...], preferred_element_type=jnp.float32) + bk_ref[...]

    pad_c = padc_ref[0]                           # (1, N): 1.0 on padded (key) columns
    pad_r = padr_ref[0]                           # (N, 1): 1.0 on padded (query) rows
    mask_bias = pad_c * 50.0 + pad_r * 50.0       # symmetric in row/col padding

    # scores[i, j] = q_i . k_j  — contract D directly, no explicit k.T through the XLU.
    dn = (((1,), (1,)), ((), ()))
    a = jnp.maximum(
        jax.lax.dot_general(q, k, dn, preferred_element_type=jnp.float32) - mask_bias, -40.0)
    # A^T via a second MXU matmul (mask_bias is symmetric), saves a transpose downstream.
    a_t = jnp.maximum(
        jax.lax.dot_general(k, q, dn, preferred_element_type=jnp.float32) - mask_bias, -40.0)

    # root = Linear(D, 1)(x), masked and clamped; computed as (1, N) on the lane axis.
    root = jax.lax.dot_general(wr_ref[...], x, dn, preferred_element_type=jnp.float32) + br_ref[...]
    root = jnp.maximum(root - pad_c * 50.0, -40.0)                                # (1, N)

    n = a.shape[0]
    eye = (jax.lax.broadcasted_iota(jnp.int32, (n, n), 0)
           == jax.lax.broadcasted_iota(jnp.int32, (n, n), 1))
    colsum = jnp.sum(a, axis=0, keepdims=True)                                    # (1, N)
    # LL = diag(colsum(A)) - A + diag(root)
    ll = jnp.where(eye, colsum + root, 0.0) - a

    at_ref[0] = a_t
    ll_ref[0] = ll
    root_ref[0] = root


def structure_scores(x, wq, bq, wk, bk, wr, br, pad_col, pad_row):
    B, N, D = x.shape
    kern = functools.partial(_structure_scores_kernel, scale=1.0 / math.sqrt(D))
    return pl.pallas_call(
        kern,
        out_shape=(jax.ShapeDtypeStruct((B, N, N), jnp.float32),   # A^T
                   jax.ShapeDtypeStruct((B, N, N), jnp.float32),   # LL
                   jax.ShapeDtypeStruct((B, 1, N), jnp.float32)),  # root (masked, clamped)
        grid=(B,),
        in_specs=[
            pl.BlockSpec((1, N, D), lambda b: (b, 0, 0)),
            pl.BlockSpec((D, D), lambda b: (0, 0)),
            pl.BlockSpec((1, D), lambda b: (0, 0)),
            pl.BlockSpec((D, D), lambda b: (0, 0)),
            pl.BlockSpec((1, D), lambda b: (0, 0)),
            pl.BlockSpec((1, D), lambda b: (0, 0)),
            pl.BlockSpec((1, 1), lambda b: (0, 0)),
            pl.BlockSpec((1, 1, N), lambda b: (b, 0, 0)),
            pl.BlockSpec((1, N, 1), lambda b: (b, 0, 0)),
        ],
        out_specs=[
            pl.BlockSpec((1, N, N), lambda b: (b, 0, 0)),
            pl.BlockSpec((1, N, N), lambda b: (b, 0, 0)),
            pl.BlockSpec((1, 1, N), lambda b: (b, 0, 0)),
        ],
        compiler_params=_PARALLEL_1D,
    )(x, wq, bq, wk, bk, wr, br, pad_col, pad_row)


# ----------------------------------------------------------------------------
# Kernel 3: matrix-tree marginals, column mask, F.normalize(attn, dim=1)
# ----------------------------------------------------------------------------
def _tree_marginal_kernel(at_ref, inv_ref, root_ref, padc_ref,
                          attn_ref, attn_norm_ref, d0_ref):
    a_t = at_ref[0]                              # (N, N) = A^T
    inv = inv_ref[0]                             # (N, N) = LL^-1
    root = root_ref[0]                           # (1, N)
    pad_c = padc_ref[0]                          # (1, N)
    n = a_t.shape[0]
    eye = (jax.lax.broadcasted_iota(jnp.int32, (n, n), 0)
           == jax.lax.broadcasted_iota(jnp.int32, (n, n), 1)).astype(jnp.float32)
    inv_diag_row = jnp.sum(inv * eye, axis=0, keepdims=True)   # diag(LL^-1) as (1, N)
    inv_diag_col = jnp.sum(inv * eye, axis=1, keepdims=True)   # diag(LL^-1) as (N, 1)

    d0 = root * inv_diag_row                                   # root marginals (1, N)
    # attn[i, j] = A[j, i] * (diag[i] - LL^-1[i, j]);  zero padded key columns j.
    attn = a_t * (inv_diag_col - inv) * (1.0 - pad_c)
    # F.normalize(attn, p=2, dim=1): per-column L2 norm, eps=1e-12 (EUP rsqrt, no div).
    inv_norm = jnp.minimum(jax.lax.rsqrt(jnp.sum(attn * attn, axis=0, keepdims=True)), 1e12)

    attn_ref[0] = attn
    attn_norm_ref[0] = attn * inv_norm
    d0_ref[0] = d0


def tree_marginals(a_t, ll_inv, root, pad_col):
    B, N, _ = a_t.shape
    return pl.pallas_call(
        _tree_marginal_kernel,
        out_shape=(jax.ShapeDtypeStruct((B, N, N), jnp.float32),   # attn (masked, unnormalized)
                   jax.ShapeDtypeStruct((B, N, N), jnp.float32),   # F.normalize(attn)
                   jax.ShapeDtypeStruct((B, 1, N), jnp.float32)),  # d0 (roots)
        grid=(B,),
        in_specs=[
            pl.BlockSpec((1, N, N), lambda b: (b, 0, 0)),
            pl.BlockSpec((1, N, N), lambda b: (b, 0, 0)),
            pl.BlockSpec((1, 1, N), lambda b: (b, 0, 0)),
            pl.BlockSpec((1, 1, N), lambda b: (b, 0, 0)),
        ],
        out_specs=[
            pl.BlockSpec((1, N, N), lambda b: (b, 0, 0)),
            pl.BlockSpec((1, N, N), lambda b: (b, 0, 0)),
            pl.BlockSpec((1, 1, N), lambda b: (b, 0, 0)),
        ],
        compiler_params=_PARALLEL_1D,
    )(a_t, ll_inv, root, pad_col)


# ----------------------------------------------------------------------------
# Kernel 4: one TMT refinement step
#   new_c = LN( W2( relu( W1( cat([vec, attn@vec], -1) ) ) ) )
# ----------------------------------------------------------------------------
def _tmt_refine_kernel(attn_ref, vec_ref, w1a_ref, w1b_ref, b1_ref, w2_ref, b2_ref,
                       g_ref, beta_ref, o_ref):
    attn = attn_ref[0]
    vec = vec_ref[0].astype(jnp.float32)
    ctx = jnp.dot(attn, vec, preferred_element_type=jnp.float32)               # (N, D)
    # cat([vec, ctx], -1) @ W1 decomposed into two matmuls (no concat materialized).
    h = (jnp.dot(vec, w1a_ref[...], preferred_element_type=jnp.float32)
         + jnp.dot(ctx, w1b_ref[...], preferred_element_type=jnp.float32) + b1_ref[...])
    h = jnp.maximum(h, 0.0)                                                    # ReLU
    y = jnp.dot(h, w2_ref[...], preferred_element_type=jnp.float32) + b2_ref[...]
    mu = jnp.mean(y, axis=-1, keepdims=True)                                   # LayerNorm(eps=1e-6)
    var = jnp.mean(jnp.square(y - mu), axis=-1, keepdims=True)
    o_ref[0] = ((y - mu) * jax.lax.rsqrt(var + 1e-6) * g_ref[...] + beta_ref[...]).astype(o_ref.dtype)


def tmt_refine(attn, vec, w1a, w1b, b1, w2, b2, ln_g, ln_b):
    B, N, D = vec.shape
    return pl.pallas_call(
        _tmt_refine_kernel,
        out_shape=jax.ShapeDtypeStruct((B, N, D), vec.dtype),
        grid=(B,),
        in_specs=[
            pl.BlockSpec((1, N, N), lambda b: (b, 0, 0)),
            pl.BlockSpec((1, N, D), lambda b: (b, 0, 0)),
            pl.BlockSpec((D, D), lambda b: (0, 0)),
            pl.BlockSpec((D, D), lambda b: (0, 0)),
            pl.BlockSpec((1, D), lambda b: (0, 0)),
            pl.BlockSpec((D, D), lambda b: (0, 0)),
            pl.BlockSpec((1, D), lambda b: (0, 0)),
            pl.BlockSpec((1, D), lambda b: (0, 0)),
            pl.BlockSpec((1, D), lambda b: (0, 0)),
        ],
        out_specs=pl.BlockSpec((1, N, D), lambda b: (b, 0, 0)),
        compiler_params=_PARALLEL_1D,
    )(attn, vec, w1a, w1b, b1, w2, b2, ln_g, ln_b)


# ----------------------------------------------------------------------------
# TreeInference forward (glue in JAX, hot-path compute in the kernels above)
# ----------------------------------------------------------------------------
def tree_inference(params, sent_vec, mask_block):
    B, N, D = sent_vec.shape
    maskf = mask_block.astype(jnp.float32)            # 1.0 = valid
    padf = 1.0 - maskf                                # == (~mask_block).float(), 1.0 = padded
    pe = params["pe"][:N]                             # (N, D)

    # sent_vec = LayerNorm(sent_vec + pe) * mask
    x = embed_norm(sent_vec, pe, params["ln2_g"], params["ln2_b"], maskf.reshape(B, N, 1))
    pad_col = padf.reshape(B, 1, N)
    pad_row = padf.reshape(B, N, 1)

    structure_vec = x
    roots, attns = [], []
    n_layers = len(params["layers"])
    for li, p in enumerate(params["layers"]):
        a_t, ll, root = structure_scores(structure_vec, p["wq"], p["bq"], p["wk"], p["bk"],
                                         p["wr"], p["br"], pad_col, pad_row)
        # TODO(synk): torch.inverse (batched dense inverse w/ pivoting) has no clean Pallas
        # equivalent; the tiny (N, N) LU inverse stays in XLA between the two fused kernels.
        ll_inv = jnp.linalg.inv(ll)
        attn, attn_norm, d0 = tree_marginals(a_t, ll_inv, root, pad_col)

        roots.append(d0.reshape(B, N))
        attns.append(attn_norm)

        # TMTLayer(i) runs `iter = i` refinement steps on vecs[0] = x; the refined vector only
        # feeds the NEXT layer's structured attention, so it is dead work for the last layer.
        if li + 1 < n_layers:
            vec = x
            for q in p["iters"]:
                vec = tmt_refine(attn, vec, q["w1a"], q["w1b"], q["b1"],
                                 q["w2"], q["b2"], q["ln_g"], q["ln_b"])
            structure_vec = vec

    return roots, attns


# ----------------------------------------------------------------------------
# Deterministic synthetic parameters (shapes follow the nn.Module __init__).
# Linear weights stored (in_features, out_features) so kernels compute x @ W + b.
# ----------------------------------------------------------------------------
def init_params(key, d_model, num_inter_layers, max_len=5000):
    def dense(k, din, dout):
        kw, kb = jax.random.split(k)
        s = 1.0 / math.sqrt(din)
        w = jax.random.uniform(kw, (din, dout), jnp.float32, -s, s)
        b = jax.random.uniform(kb, (1, dout), jnp.float32, -s, s)
        return w, b

    # PositionalEncoding buffer
    pos = jnp.arange(max_len, dtype=jnp.float32)[:, None]
    div = jnp.exp(jnp.arange(0, d_model, 2, dtype=jnp.float32) * (-math.log(10000.0) / d_model))
    ang = pos * div[None, :]
    pe = jnp.zeros((max_len, d_model), jnp.float32)
    pe = pe.at[:, 0::2].set(jnp.sin(ang)).at[:, 1::2].set(jnp.cos(ang))

    layers = []
    for i in range(num_inter_layers):
        key, kq, kk, kr = jax.random.split(key, 4)
        wq, bq = dense(kq, d_model, d_model)
        wk, bk = dense(kk, d_model, d_model)
        wr_full, br = dense(kr, d_model, 1)           # nn.Linear(d_model, 1)
        iters = []
        for _ in range(i):                            # TMTLayer(iter=i) owns i refinement blocks
            key, k1a, k1b, kb1, k2 = jax.random.split(key, 5)
            s1 = 1.0 / math.sqrt(2 * d_model)         # fan_in of the 2D->D linear
            w1a = jax.random.uniform(k1a, (d_model, d_model), jnp.float32, -s1, s1)
            w1b = jax.random.uniform(k1b, (d_model, d_model), jnp.float32, -s1, s1)
            b1 = jax.random.uniform(kb1, (1, d_model), jnp.float32, -s1, s1)
            w2, b2 = dense(k2, d_model, d_model)
            iters.append(dict(w1a=w1a, w1b=w1b, b1=b1, w2=w2, b2=b2,
                              ln_g=jnp.ones((1, d_model), jnp.float32),
                              ln_b=jnp.zeros((1, d_model), jnp.float32)))
        layers.append(dict(wq=wq, bq=bq, wk=wk, bk=bk,
                           wr=wr_full.T,              # (1, d_model) row layout for the kernel
                           br=br,                     # (1, 1)
                           iters=iters))
    return dict(pe=pe,
                ln2_g=jnp.ones((1, d_model), jnp.float32),
                ln2_b=jnp.zeros((1, d_model), jnp.float32),
                layers=layers)


# TODO(synk): nn.Dropout (and the never-called PositionwiseFeedForward / softmax members of
# StructuredAttention) play no role in the eval forward pass; dropout is identity here.

if __name__ == "__main__":
    B, N, D, N_LAYERS = 2, 8, 32, 2

    key = jax.random.PRNGKey(0)
    k_x, k_p = jax.random.split(key)

    sent_vec = jax.random.normal(k_x, (B, N, D), jnp.float32)
    lengths = jnp.array([N, 5])
    mask_block = jnp.arange(N)[None, :] < lengths[:, None]     # bool (B, N), True = valid

    params = init_params(k_p, D, N_LAYERS)

    fwd = jax.jit(tree_inference)
    roots, attns = fwd(params, sent_vec, mask_block)
    jax.block_until_ready((roots, attns))

    assert len(roots) == N_LAYERS and len(attns) == N_LAYERS
    assert roots[0].shape == (B, N) and attns[0].shape == (B, N, N)
    assert all(bool(jnp.all(jnp.isfinite(r))) for r in roots)
    assert all(bool(jnp.all(jnp.isfinite(a))) for a in attns)
    print("KERNEL_OK")
</pallas_src>

<mosaic_0001>
module attributes {stable_mosaic.version = 11 : i64} {
  func.func @_structure_scores_kernel(%arg0: i32, %arg1: memref<1x8x32xf32, #tpu.memory_space<vmem>>, %arg2: memref<32x32xf32, #tpu.memory_space<vmem>>, %arg3: memref<1x32xf32, #tpu.memory_space<vmem>>, %arg4: memref<32x32xf32, #tpu.memory_space<vmem>>, %arg5: memref<1x32xf32, #tpu.memory_space<vmem>>, %arg6: memref<1x32xf32, #tpu.memory_space<vmem>>, %arg7: memref<1x1xf32, #tpu.memory_space<vmem>>, %arg8: memref<1x1x8xf32, #tpu.memory_space<vmem>>, %arg9: memref<1x8x1xf32, #tpu.memory_space<vmem>>, %arg10: memref<1x8x8xf32, #tpu.memory_space<vmem>>, %arg11: memref<1x8x8xf32, #tpu.memory_space<vmem>>, %arg12: memref<1x1x8xf32, #tpu.memory_space<vmem>>) attributes {dimension_semantics = [#tpu.dimension_semantics<parallel>], iteration_bounds = array<i64: 2>, scalar_prefetch = 0 : i64, scratch_operands = 0 : i64, tpu.core_type = #tpu.core_type<tc>, window_params = [{transform_indices = @transform_0, window_bounds = array<i64: 1, 8, 32>}, {pipeline_mode = #tpu.pipeline_mode<synchronous>, transform_indices = @transform_1, window_bounds = array<i64: 32, 32>}, {pipeline_mode = #tpu.pipeline_mode<synchronous>, transform_indices = @transform_2, window_bounds = array<i64: 1, 32>}, {pipeline_mode = #tpu.pipeline_mode<synchronous>, transform_indices = @transform_3, window_bounds = array<i64: 32, 32>}, {pipeline_mode = #tpu.pipeline_mode<synchronous>, transform_indices = @transform_4, window_bounds = array<i64: 1, 32>}, {pipeline_mode = #tpu.pipeline_mode<synchronous>, transform_indices = @transform_5, window_bounds = array<i64: 1, 32>}, {pipeline_mode = #tpu.pipeline_mode<synchronous>, transform_indices = @transform_6, window_bounds = array<i64: 1, 1>}, {transform_indices = @transform_7, window_bounds = array<i64: 1, 1, 8>}, {transform_indices = @transform_8, window_bounds = array<i64: 1, 8, 1>}, {transform_indices = @transform_9, window_bounds = array<i64: 1, 8, 8>}, {transform_indices = @transform_10, window_bounds = array<i64: 1, 8, 8>}, {transform_indices = @transform_11, window_bounds = array<i64: 1, 1, 8>}]} {
    %c0 = arith.constant 0 : index
    %c0_0 = arith.constant 0 : index
    %c0_1 = arith.constant 0 : index
    %0 = vector.load %arg1[%c0, %c0_0, %c0_1] : memref<1x8x32xf32, #tpu.memory_space<vmem>>, vector<1x8x32xf32>
    %1 = vector.shape_cast %0 : vector<1x8x32xf32> to vector<8x32xf32>
    %c0_2 = arith.constant 0 : index
    %c0_3 = arith.constant 0 : index
    %2 = vector.load %arg2[%c0_2, %c0_3] : memref<32x32xf32, #tpu.memory_space<vmem>>, vector<32x32xf32>
    %cst = arith.constant dense<0.000000e+00> : vector<8x32xf32>
    %3 = tpu.matmul %1, %2, %cst {dimension_numbers = #tpu.dot_dimension_numbers<[1], [0], [0], [1], [0, 0, 1, 1], [], []>} : vector<8x32xf32>, vector<32x32xf32>, vector<8x32xf32> -> vector<8x32xf32>
    %c0_4 = arith.constant 0 : index
    %c0_5 = arith.constant 0 : index
    %4 = vector.load %arg3[%c0_4, %c0_5] : memref<1x32xf32, #tpu.memory_space<vmem>>, vector<1x32xf32>
    %5 = vector.broadcast %4 : vector<1x32xf32> to vector<8x32xf32>
    %6 = arith.addf %3, %5 : vector<8x32xf32>
    %cst_6 = arith.constant 0.176776692 : f32
    %7 = vector.broadcast %cst_6 : f32 to vector<8x32xf32>
    %8 = arith.mulf %6, %7 : vector<8x32xf32>
    %c0_7 = arith.constant 0 : index
    %c0_8 = arith.constant 0 : index
    %9 = vector.load %arg4[%c0_7, %c0_8] : memref<32x32xf32, #tpu.memory_space<vmem>>, vector<32x32xf32>
    %cst_9 = arith.constant dense<0.000000e+00> : vector<8x32xf32>
    %10 = tpu.matmul %1, %9, %cst_9 {dimension_numbers = #tpu.dot_dimension_numbers<[1], [0], [0], [1], [0, 0, 1, 1], [], []>} : vector<8x32xf32>, vector<32x32xf32>, vector<8x32xf32> -> vector<8x32xf32>
    %c0_10 = arith.constant 0 : index
    %c0_11 = arith.constant 0 : index
    %11 = vector.load %arg5[%c0_10, %c0_11] : memref<1x32xf32, #tpu.memory_space<vmem>>, vector<1x32xf32>
    %12 = vector.broadcast %11 : vector<1x32xf32> to vector<8x32xf32>
    %13 = arith.addf %10, %12 : vector<8x32xf32>
    %c0_12 = arith.constant 0 : index
    %c0_13 = arith.constant 0 : index
    %c0_14 = arith.constant 0 : index
    %14 = vector.load %arg8[%c0_12, %c0_13, %c0_14] : memref<1x1x8xf32, #tpu.memory_space<vmem>>, vector<1x1x8xf32>
    %15 = vector.shape_cast %14 : vector<1x1x8xf32> to vector<1x8xf32>
    %c0_15 = arith.constant 0 : index
    %c0_16 = arith.constant 0 : index
    %c0_17 = arith.constant 0 : index
    %16 = vector.load %arg9[%c0_15, %c0_16, %c0_17] : memref<1x8x1xf32, #tpu.memory_space<vmem>>, vector<1x8x1xf32>
    %17 = vector.shape_cast %16 : vector<1x8x1xf32> to vector<8x1xf32>
    %cst_18 = arith.constant 5.000000e+01 : f32
    %18 = vector.broadcast %cst_18 : f32 to vector<1x8xf32>
    %19 = arith.mulf %15, %18 : vector<1x8xf32>
    %cst_19 = arith.constant 5.000000e+01 : f32
    %20 = vector.broadcast %cst_19 : f32 to vector<8x1xf32>
    %21 = arith.mulf %17, %20 : vector<8x1xf32>
    %22 = vector.broadcast %19 : vector<1x8xf32> to vector<8x8xf32>
    %23 = vector.broadcast %21 : vector<8x1xf32> to vector<8x8xf32>
    %24 = arith.addf %22, %23 : vector<8x8xf32>
    %cst_20 = arith.constant dense<0.000000e+00> : vector<8x8xf32>
    %25 = tpu.matmul %8, %13, %cst_20 {dimension_numbers = #tpu.dot_dimension_numbers<[1], [1], [0], [0], [0, 0, 1, 0], [], []>} : vector<8x32xf32>, vector<8x32xf32>, vector<8x8xf32> -> vector<8x8xf32>
    %26 = arith.subf %25, %24 : vector<8x8xf32>
    %cst_21 = arith.constant -4.000000e+01 : f32
    %27 = vector.broadcast %cst_21 : f32 to vector<8x8xf32>
    %28 = arith.maximumf %26, %27 : vector<8x8xf32>
    %cst_22 = arith.constant dense<0.000000e+00> : vector<8x8xf32>
    %29 = tpu.matmul %13, %8, %cst_22 {dimension_numbers = #tpu.dot_dimension_numbers<[1], [1], [0], [0], [0, 0, 1, 0], [], []>} : vector<8x32xf32>, vector<8x32xf32>, vector<8x8xf32> -> vector<8x8xf32>
    %30 = arith.subf %29, %24 : vector<8x8xf32>
    %cst_23 = arith.constant -4.000000e+01 : f32
    %31 = vector.broadcast %cst_23 : f32 to vector<8x8xf32>
    %32 = arith.maximumf %30, %31 : vector<8x8xf32>
    %c0_24 = arith.constant 0 : index
    %c0_25 = arith.constant 0 : index
    %33 = vector.load %arg6[%c0_24, %c0_25] : memref<1x32xf32, #tpu.memory_space<vmem>>, vector<1x32xf32>
    %cst_26 = arith.constant dense<0.000000e+00> : vector<1x8xf32>
    %34 = tpu.matmul %33, %1, %cst_26 {dimension_numbers = #tpu.dot_dimension_numbers<[1], [1], [0], [0], [0, 0, 1, 0], [], []>} : vector<1x32xf32>, vector<8x32xf32>, vector<1x8xf32> -> vector<1x8xf32>
    %c0_27 = arith.constant 0 : index
    %c0_28 = arith.constant 0 : index
    %35 = vector.load %arg7[%c0_27, %c0_28] : memref<1x1xf32, #tpu.memory_space<vmem>>, vector<1x1xf32>
    %36 = vector.broadcast %35 : vector<1x1xf32> to vector<1x8xf32>
    %37 = arith.addf %34, %36 : vector<1x8xf32>
    %cst_29 = arith.constant 5.000000e+01 : f32
    %38 = vector.broadcast %cst_29 : f32 to vector<1x8xf32>
    %39 = arith.mulf %15, %38 : vector<1x8xf32>
    %40 = arith.subf %37, %39 : vector<1x8xf32>
    %cst_30 = arith.constant -4.000000e+01 : f32
    %41 = vector.broadcast %cst_30 : f32 to vector<1x8xf32>
    %42 = arith.maximumf %40, %41 : vector<1x8xf32>
    %43 = tpu.iota {dimensions = array<i32: 0>} : vector<8x8xi32>
    %44 = tpu.iota {dimensions = array<i32: 1>} : vector<8x8xi32>
    %45 = arith.cmpi eq, %43, %44 : vector<8x8xi32>
    %cst_31 = arith.constant dense<0.000000e+00> : vector<8xf32>
    %46 = vector.multi_reduction <add>, %28, %cst_31 [0] : vector<8x8xf32> to vector<8xf32>
    %47 = vector.shape_cast %46 : vector<8xf32> to vector<1x8xf32>
    %48 = arith.addf %47, %42 : vector<1x8xf32>
    %cst_32 = arith.constant 0.000000e+00 : f32
    %49 = vector.shape_cast %48 : vector<1x8xf32> to vector<1x8xf32>
    %50 = vector.broadcast %49 : vector<1x8xf32> to vector<8x8xf32>
    %51 = vector.broadcast %cst_32 : f32 to vector<8x8xf32>
    %52 = arith.select %45, %50, %51 : vector<8x8xi1>, vector<8x8xf32>
    %53 = arith.subf %52, %28 : vector<8x8xf32>
    %c0_33 = arith.constant 0 : index
    %c0_34 = arith.constant 0 : index
    %c0_35 = arith.constant 0 : index
    %54 = vector.load %arg10[%c0_33, %c0_34, %c0_35] : memref<1x8x8xf32, #tpu.memory_space<vmem>>, vector<1x8x8xf32>
    %55 = vector.shape_cast %54 : vector<1x8x8xf32> to vector<8x8xf32>
    %56 = vector.shape_cast %32 : vector<8x8xf32> to vector<1x8x8xf32>
    tpu.vector_store %arg10[%c0_33, %c0_34, %c0_35], %56 {strides = array<i32>} : memref<1x8x8xf32, #tpu.memory_space<vmem>>, vector<1x8x8xf32>,
    %c0_36 = arith.constant 0 : index
    %c0_37 = arith.constant 0 : index
    %c0_38 = arith.constant 0 : index
    %57 = vector.load %arg11[%c0_36, %c0_37, %c0_38] : memref<1x8x8xf32, #tpu.memory_space<vmem>>, vector<1x8x8xf32>
    %58 = vector.shape_cast %57 : vector<1x8x8xf32> to vector<8x8xf32>
    %59 = vector.shape_cast %53 : vector<8x8xf32> to vector<1x8x8xf32>
    tpu.vector_store %arg11[%c0_36, %c0_37, %c0_38], %59 {strides = array<i32>} : memref<1x8x8xf32, #tpu.memory_space<vmem>>, vector<1x8x8xf32>,
    %c0_39 = arith.constant 0 : index
    %c0_40 = arith.constant 0 : index
    %c0_41 = arith.constant 0 : index
    %60 = vector.load %arg12[%c0_39, %c0_40, %c0_41] : memref<1x1x8xf32, #tpu.memory_space<vmem>>, vector<1x1x8xf32>
    %61 = vector.shape_cast %60 : vector<1x1x8xf32> to vector<1x8xf32>
    %62 = vector.shape_cast %42 : vector<1x8xf32> to vector<1x1x8xf32>
    tpu.vector_store %arg12[%c0_39, %c0_40, %c0_41], %62 {strides = array<i32>} : memref<1x1x8xf32, #tpu.memory_space<vmem>>, vector<1x1x8xf32>,
    return
  }
  func.func @transform_0(%arg0: i32) -> (i32, i32, i32) {
    %c0_i32 = arith.constant 0 : i32
    %c0_i32_0 = arith.constant 0 : i32
    %c0_i32_1 = arith.constant 0 : i32
    return %arg0, %c0_i32, %c0_i32_0 : i32, i32, i32
  }
  func.func @transform_1(%arg0: i32) -> (i32, i32) {
    %c0_i32 = arith.constant 0 : i32
    %c0_i32_0 = arith.constant 0 : i32
    %c0_i32_1 = arith.constant 0 : i32
    return %c0_i32, %c0_i32_0 : i32, i32
  }
  func.func @transform_2(%arg0: i32) -> (i32, i32) {
    %c0_i32 = arith.constant 0 : i32
    %c0_i32_0 = arith.constant 0 : i32
    %c0_i32_1 = arith.constant 0 : i32
    return %c0_i32, %c0_i32_0 : i32, i32
  }
  func.func @transform_3(%arg0: i32) -> (i32, i32) {
    %c0_i32 = arith.constant 0 : i32
    %c0_i32_0 = arith.constant 0 : i32
    %c0_i32_1 = arith.constant 0 : i32
    return %c0_i32, %c0_i32_0 : i32, i32
  }
  func.func @transform_4(%arg0: i32) -> (i32, i32) {
    %c0_i32 = arith.constant 0 : i32
    %c0_i32_0 = arith.constant 0 : i32
    %c0_i32_1 = arith.constant 0 : i32
    return %c0_i32, %c0_i32_0 : i32, i32
  }
  func.func @transform_5(%arg0: i32) -> (i32, i32) {
    %c0_i32 = arith.constant 0 : i32
    %c0_i32_0 = arith.constant 0 : i32
    %c0_i32_1 = arith.constant 0 : i32
    return %c0_i32, %c0_i32_0 : i32, i32
  }
  func.func @transform_6(%arg0: i32) -> (i32, i32) {
    %c0_i32 = arith.constant 0 : i32
    %c0_i32_0 = arith.constant 0 : i32
    %c0_i32_1 = arith.constant 0 : i32
    return %c0_i32, %c0_i32_0 : i32, i32
  }
  func.func @transform_7(%arg0: i32) -> (i32, i32, i32) {
    %c0_i32 = arith.constant 0 : i32
    %c0_i32_0 = arith.constant 0 : i32
    %c0_i32_1 = arith.constant 0 : i32
    return %arg0, %c0_i32, %c0_i32_0 : i32, i32, i32
  }
  func.func @transform_8(%arg0: i32) -> (i32, i32, i32) {
    %c0_i32 = arith.constant 0 : i32
    %c0_i32_0 = arith.constant 0 : i32
    %c0_i32_1 = arith.constant 0 : i32
    return %arg0, %c0_i32, %c0_i32_0 : i32, i32, i32
  }
  func.func @transform_9(%arg0: i32) -> (i32, i32, i32) {
    %c0_i32 = arith.constant 0 : i32
    %c0_i32_0 = arith.constant 0 : i32
    %c0_i32_1 = arith.constant 0 : i32
    return %arg0, %c0_i32, %c0_i32_0 : i32, i32, i32
  }
  func.func @transform_10(%arg0: i32) -> (i32, i32, i32) {
    %c0_i32 = arith.constant 0 : i32
    %c0_i32_0 = arith.constant 0 : i32
    %c0_i32_1 = arith.constant 0 : i32
    return %arg0, %c0_i32, %c0_i32_0 : i32, i32, i32
  }
  func.func @transform_11(%arg0: i32) -> (i32, i32, i32) {
    %c0_i32 = arith.constant 0 : i32
    %c0_i32_0 = arith.constant 0 : i32
    %c0_i32_1 = arith.constant 0 : i32
    return %arg0, %c0_i32, %c0_i32_0 : i32, i32, i32
  }
}

module attributes {stable_mosaic.version = 11 : i64} {
  func.func @_embed_norm_kernel(%arg0: i32, %arg1: memref<1x8x32xf32, #tpu.memory_space<vmem>>, %arg2: memref<8x32xf32, #tpu.memory_space<vmem>>, %arg3: memref<1x32xf32, #tpu.memory_space<vmem>>, %arg4: memref<1x32xf32, #tpu.memory_space<vmem>>, %arg5: memref<1x8x1xf32, #tpu.memory_space<vmem>>, %arg6: memref<1x8x32xf32, #tpu.memory_space<vmem>>) attributes {dimension_semantics = [#tpu.dimension_semantics<parallel>], iteration_bounds = array<i64: 2>, scalar_prefetch = 0 : i64, scratch_operands = 0 : i64, tpu.core_type = #tpu.core_type<tc>, window_params = [{transform_indices = @transform_0, window_bounds = array<i64: 1, 8, 32>}, {pipeline_mode = #tpu.pipeline_mode<synchronous>, transform_indices = @transform_1, window_bounds = array<i64: 8, 32>}, {pipeline_mode = #tpu.pipeline_mode<synchronous>, transform_indices = @transform_2, window_bounds = array<i64: 1, 32>}, {pipeline_mode = #tpu.pipeline_mode<synchronous>, transform_indices = @transform_3, window_bounds = array<i64: 1, 32>}, {transform_indices = @transform_4, window_bounds = array<i64: 1, 8, 1>}, {transform_indices = @transform_5, window_bounds = array<i64: 1, 8, 32>}]} {
    %c0 = arith.constant 0 : index
    %c0_0 = arith.constant 0 : index
    %c0_1 = arith.constant 0 : index
    %0 = vector.load %arg1[%c0, %c0_0, %c0_1] : memref<1x8x32xf32, #tpu.memory_space<vmem>>, vector<1x8x32xf32>
    %1 = vector.shape_cast %0 : vector<1x8x32xf32> to vector<8x32xf32>
    %c0_2 = arith.constant 0 : index
    %c0_3 = arith.constant 0 : index
    %2 = vector.load %arg2[%c0_2, %c0_3] : memref<8x32xf32, #tpu.memory_space<vmem>>, vector<8x32xf32>
    %3 = arith.addf %1, %2 : vector<8x32xf32>
    %cst = arith.constant dense<0.000000e+00> : vector<8xf32>
    %4 = vector.multi_reduction <add>, %3, %cst [1] : vector<8x32xf32> to vector<8xf32>
    %5 = vector.shape_cast %4 : vector<8xf32> to vector<8x1xf32>
    %cst_4 = arith.constant 3.200000e+01 : f32
    %6 = vector.broadcast %cst_4 : f32 to vector<8x1xf32>
    %7 = arith.divf %5, %6 : vector<8x1xf32>
    %8 = vector.broadcast %7 : vector<8x1xf32> to vector<8x32xf32>
    %9 = arith.subf %3, %8 : vector<8x32xf32>
    %10 = arith.mulf %9, %9 : vector<8x32xf32>
    %cst_5 = arith.constant dense<0.000000e+00> : vector<8xf32>
    %11 = vector.multi_reduction <add>, %10, %cst_5 [1] : vector<8x32xf32> to vector<8xf32>
    %12 = vector.shape_cast %11 : vector<8xf32> to vector<8x1xf32>
    %cst_6 = arith.constant 3.200000e+01 : f32
    %13 = vector.broadcast %cst_6 : f32 to vector<8x1xf32>
    %14 = arith.divf %12, %13 : vector<8x1xf32>
    %15 = vector.broadcast %7 : vector<8x1xf32> to vector<8x32xf32>
    %16 = arith.subf %3, %15 : vector<8x32xf32>
    %cst_7 = arith.constant 9.99999997E-7 : f32
    %17 = vector.broadcast %cst_7 : f32 to vector<8x1xf32>
    %18 = arith.addf %14, %17 : vector<8x1xf32>
    %19 = math.rsqrt %18 : vector<8x1xf32>
    %20 = vector.broadcast %19 : vector<8x1xf32> to vector<8x32xf32>
    %21 = arith.mulf %16, %20 : vector<8x32xf32>
    %c0_8 = arith.constant 0 : index
    %c0_9 = arith.constant 0 : index
    %22 = vector.load %arg3[%c0_8, %c0_9] : memref<1x32xf32, #tpu.memory_space<vmem>>, vector<1x32xf32>
    %23 = vector.broadcast %22 : vector<1x32xf32> to vector<8x32xf32>
    %24 = arith.mulf %21, %23 : vector<8x32xf32>
    %c0_10 = arith.constant 0 : index
    %c0_11 = arith.constant 0 : index
    %25 = vector.load %arg4[%c0_10, %c0_11] : memref<1x32xf32, #tpu.memory_space<vmem>>, vector<1x32xf32>
    %26 = vector.broadcast %25 : vector<1x32xf32> to vector<8x32xf32>
    %27 = arith.addf %24, %26 : vector<8x32xf32>
    %c0_12 = arith.constant 0 : index
    %c0_13 = arith.constant 0 : index
    %c0_14 = arith.constant 0 : index
    %28 = vector.load %arg5[%c0_12, %c0_13, %c0_14] : memref<1x8x1xf32, #tpu.memory_space<vmem>>, vector<1x8x1xf32>
    %29 = vector.shape_cast %28 : vector<1x8x1xf32> to vector<8x1xf32>
    %30 = vector.broadcast %29 : vector<8x1xf32> to vector<8x32xf32>
    %31 = arith.mulf %27, %30 : vector<8x32xf32>
    %c0_15 = arith.constant 0 : index
    %c0_16 = arith.constant 0 : index
    %c0_17 = arith.constant 0 : index
    %32 = vector.load %arg6[%c0_15, %c0_16, %c0_17] : memref<1x8x32xf32, #tpu.memory_space<vmem>>, vector<1x8x32xf32>
    %33 = vector.shape_cast %32 : vector<1x8x32xf32> to vector<8x32xf32>
    %34 = vector.shape_cast %31 : vector<8x32xf32> to vector<1x8x32xf32>
    tpu.vector_store %arg6[%c0_15, %c0_16, %c0_17], %34 {strides = array<i32>} : memref<1x8x32xf32, #tpu.memory_space<vmem>>, vector<1x8x32xf32>,
    return
  }
  func.func @transform_0(%arg0: i32) -> (i32, i32, i32) {
    %c0_i32 = arith.constant 0 : i32
    %c0_i32_0 = arith.constant 0 : i32
    %c0_i32_1 = arith.constant 0 : i32
    return %arg0, %c0_i32, %c0_i32_0 : i32, i32, i32
  }
  func.func @transform_1(%arg0: i32) -> (i32, i32) {
    %c0_i32 = arith.constant 0 : i32
    %c0_i32_0 = arith.constant 0 : i32
    %c0_i32_1 = arith.constant 0 : i32
    return %c0_i32, %c0_i32_0 : i32, i32
  }
  func.func @transform_2(%arg0: i32) -> (i32, i32) {
    %c0_i32 = arith.constant 0 : i32
    %c0_i32_0 = arith.constant 0 : i32
    %c0_i32_1 = arith.constant 0 : i32
    return %c0_i32, %c0_i32_0 : i32, i32
  }
  func.func @transform_3(%arg0: i32) -> (i32, i32) {
    %c0_i32 = arith.constant 0 : i32
    %c0_i32_0 = arith.constant 0 : i32
    %c0_i32_1 = arith.constant 0 : i32
    return %c0_i32, %c0_i32_0 : i32, i32
  }
  func.func @transform_4(%arg0: i32) -> (i32, i32, i32) {
    %c0_i32 = arith.constant 0 : i32
    %c0_i32_0 = arith.constant 0 : i32
    %c0_i32_1 = arith.constant 0 : i32
    return %arg0, %c0_i32, %c0_i32_0 : i32, i32, i32
  }
  func.func @transform_5(%arg0: i32) -> (i32, i32, i32) {
    %c0_i32 = arith.constant 0 : i32
    %c0_i32_0 = arith.constant 0 : i32
    %c0_i32_1 = arith.constant 0 : i32
    return %arg0, %c0_i32, %c0_i32_0 : i32, i32, i32
  }
}

module attributes {stable_mosaic.version = 11 : i64} {
  func.func @_tree_marginal_kernel(%arg0: i32, %arg1: memref<1x8x8xf32, #tpu.memory_space<vmem>>, %arg2: memref<1x8x8xf32, #tpu.memory_space<vmem>>, %arg3: memref<1x1x8xf32, #tpu.memory_space<vmem>>, %arg4: memref<1x1x8xf32, #tpu.memory_space<vmem>>, %arg5: memref<1x8x8xf32, #tpu.memory_space<vmem>>, %arg6: memref<1x8x8xf32, #tpu.memory_space<vmem>>, %arg7: memref<1x1x8xf32, #tpu.memory_space<vmem>>) attributes {dimension_semantics = [#tpu.dimension_semantics<parallel>], iteration_bounds = array<i64: 2>, scalar_prefetch = 0 : i64, scratch_operands = 0 : i64, tpu.core_type = #tpu.core_type<tc>, window_params = [{transform_indices = @transform_0, window_bounds = array<i64: 1, 8, 8>}, {transform_indices = @transform_1, window_bounds = array<i64: 1, 8, 8>}, {transform_indices = @transform_2, window_bounds = array<i64: 1, 1, 8>}, {transform_indices = @transform_3, window_bounds = array<i64: 1, 1, 8>}, {transform_indices = @transform_4, window_bounds = array<i64: 1, 8, 8>}, {transform_indices = @transform_5, window_bounds = array<i64: 1, 8, 8>}, {transform_indices = @transform_6, window_bounds = array<i64: 1, 1, 8>}]} {
    %c0 = arith.constant 0 : index
    %c0_0 = arith.constant 0 : index
    %c0_1 = arith.constant 0 : index
    %0 = vector.load %arg1[%c0, %c0_0, %c0_1] : memref<1x8x8xf32, #tpu.memory_space<vmem>>, vector<1x8x8xf32>
    %1 = vector.shape_cast %0 : vector<1x8x8xf32> to vector<8x8xf32>
    %c0_2 = arith.constant 0 : index
    %c0_3 = arith.constant 0 : index
    %c0_4 = arith.constant 0 : index
    %2 = vector.load %arg2[%c0_2, %c0_3, %c0_4] : memref<1x8x8xf32, #tpu.memory_space<vmem>>, vector<1x8x8xf32>
    %3 = vector.shape_cast %2 : vector<1x8x8xf32> to vector<8x8xf32>
    %c0_5 = arith.constant 0 : index
    %c0_6 = arith.constant 0 : index
    %c0_7 = arith.constant 0 : index
    %4 = vector.load %arg3[%c0_5, %c0_6, %c0_7] : memref<1x1x8xf32, #tpu.memory_space<vmem>>, vector<1x1x8xf32>
    %5 = vector.shape_cast %4 : vector<1x1x8xf32> to vector<1x8xf32>
    %c0_8 = arith.constant 0 : index
    %c0_9 = arith.constant 0 : index
    %c0_10 = arith.constant 0 : index
    %6 = vector.load %arg4[%c0_8, %c0_9, %c0_10] : memref<1x1x8xf32, #tpu.memory_space<vmem>>, vector<1x1x8xf32>
    %7 = vector.shape_cast %6 : vector<1x1x8xf32> to vector<1x8xf32>
    %8 = tpu.iota {dimensions = array<i32: 0>} : vector<8x8xi32>
    %9 = tpu.iota {dimensions = array<i32: 1>} : vector<8x8xi32>
    %10 = arith.cmpi eq, %8, %9 : vector<8x8xi32>
    %11 = arith.extui %10 : vector<8x8xi1> to vector<8x8xi32>
    %12 = arith.sitofp %11 : vector<8x8xi32> to vector<8x8xf32>
    %13 = arith.mulf %3, %12 : vector<8x8xf32>
    %cst = arith.constant dense<0.000000e+00> : vector<8xf32>
    %14 = vector.multi_reduction <add>, %13, %cst [0] : vector<8x8xf32> to vector<8xf32>
    %15 = vector.shape_cast %14 : vector<8xf32> to vector<1x8xf32>
    %16 = arith.mulf %3, %12 : vector<8x8xf32>
    %cst_11 = arith.constant dense<0.000000e+00> : vector<8xf32>
    %17 = vector.multi_reduction <add>, %16, %cst_11 [1] : vector<8x8xf32> to vector<8xf32>
    %18 = vector.shape_cast %17 : vector<8xf32> to vector<8x1xf32>
    %19 = arith.mulf %5, %15 : vector<1x8xf32>
    %20 = vector.broadcast %18 : vector<8x1xf32> to vector<8x8xf32>
    %21 = arith.subf %20, %3 : vector<8x8xf32>
    %22 = arith.mulf %1, %21 : vector<8x8xf32>
    %cst_12 = arith.constant 1.000000e+00 : f32
    %23 = vector.broadcast %cst_12 : f32 to vector<1x8xf32>
    %24 = arith.subf %23, %7 : vector<1x8xf32>
    %25 = vector.broadcast %24 : vector<1x8xf32> to vector<8x8xf32>
    %26 = arith.mulf %22, %25 : vector<8x8xf32>
    %27 = arith.mulf %26, %26 : vector<8x8xf32>
    %cst_13 = arith.constant dense<0.000000e+00> : vector<8xf32>
    %28 = vector.multi_reduction <add>, %27, %cst_13 [0] : vector<8x8xf32> to vector<8xf32>
    %29 = vector.shape_cast %28 : vector<8xf32> to vector<1x8xf32>
    %30 = math.rsqrt %29 : vector<1x8xf32>
    %cst_14 = arith.constant 9.99999995E+11 : f32
    %31 = vector.broadcast %cst_14 : f32 to vector<1x8xf32>
    %32 = arith.minimumf %30, %31 : vector<1x8xf32>
    %c0_15 = arith.constant 0 : index
    %c0_16 = arith.constant 0 : index
    %c0_17 = arith.constant 0 : index
    %33 = vector.load %arg5[%c0_15, %c0_16, %c0_17] : memref<1x8x8xf32, #tpu.memory_space<vmem>>, vector<1x8x8xf32>
    %34 = vector.shape_cast %33 : vector<1x8x8xf32> to vector<8x8xf32>
    %35 = vector.shape_cast %26 : vector<8x8xf32> to vector<1x8x8xf32>
    tpu.vector_store %arg5[%c0_15, %c0_16, %c0_17], %35 {strides = array<i32>} : memref<1x8x8xf32, #tpu.memory_space<vmem>>, vector<1x8x8xf32>,
    %36 = vector.broadcast %32 : vector<1x8xf32> to vector<8x8xf32>
    %37 = arith.mulf %26, %36 : vector<8x8xf32>
    %c0_18 = arith.constant 0 : index
    %c0_19 = arith.constant 0 : index
    %c0_20 = arith.constant 0 : index
    %38 = vector.load %arg6[%c0_18, %c0_19, %c0_20] : memref<1x8x8xf32, #tpu.memory_space<vmem>>, vector<1x8x8xf32>
    %39 = vector.shape_cast %38 : vector<1x8x8xf32> to vector<8x8xf32>
    %40 = vector.shape_cast %37 : vector<8x8xf32> to vector<1x8x8xf32>
    tpu.vector_store %arg6[%c0_18, %c0_19, %c0_20], %40 {strides = array<i32>} : memref<1x8x8xf32, #tpu.memory_space<vmem>>, vector<1x8x8xf32>,
    %c0_21 = arith.constant 0 : index
    %c0_22 = arith.constant 0 : index
    %c0_23 = arith.constant 0 : index
    %41 = vector.load %arg7[%c0_21, %c0_22, %c0_23] : memref<1x1x8xf32, #tpu.memory_space<vmem>>, vector<1x1x8xf32>
    %42 = vector.shape_cast %41 : vector<1x1x8xf32> to vector<1x8xf32>
    %43 = vector.shape_cast %19 : vector<1x8xf32> to vector<1x1x8xf32>
    tpu.vector_store %arg7[%c0_21, %c0_22, %c0_23], %43 {strides = array<i32>} : memref<1x1x8xf32, #tpu.memory_space<vmem>>, vector<1x1x8xf32>,
    return
  }
  func.func @transform_0(%arg0: i32) -> (i32, i32, i32) {
    %c0_i32 = arith.constant 0 : i32
    %c0_i32_0 = arith.constant 0 : i32
    %c0_i32_1 = arith.constant 0 : i32
    return %arg0, %c0_i32, %c0_i32_0 : i32, i32, i32
  }
  func.func @transform_1(%arg0: i32) -> (i32, i32, i32) {
    %c0_i32 = arith.constant 0 : i32
    %c0_i32_0 = arith.constant 0 : i32
    %c0_i32_1 = arith.constant 0 : i32
    return %arg0, %c0_i32, %c0_i32_0 : i32, i32, i32
  }
  func.func @transform_2(%arg0: i32) -> (i32, i32, i32) {
    %c0_i32 = arith.constant 0 : i32
    %c0_i32_0 = arith.constant 0 : i32
    %c0_i32_1 = arith.constant 0 : i32
    return %arg0, %c0_i32, %c0_i32_0 : i32, i32, i32
  }
  func.func @transform_3(%arg0: i32) -> (i32, i32, i32) {
    %c0_i32 = arith.constant 0 : i32
    %c0_i32_0 = arith.constant 0 : i32
    %c0_i32_1 = arith.constant 0 : i32
    return %arg0, %c0_i32, %c0_i32_0 : i32, i32, i32
  }
  func.func @transform_4(%arg0: i32) -> (i32, i32, i32) {
    %c0_i32 = arith.constant 0 : i32
    %c0_i32_0 = arith.constant 0 : i32
    %c0_i32_1 = arith.constant 0 : i32
    return %arg0, %c0_i32, %c0_i32_0 : i32, i32, i32
  }
  func.func @transform_5(%arg0: i32) -> (i32, i32, i32) {
    %c0_i32 = arith.constant 0 : i32
    %c0_i32_0 = arith.constant 0 : i32
    %c0_i32_1 = arith.constant 0 : i32
    return %arg0, %c0_i32, %c0_i32_0 : i32, i32, i32
  }
  func.func @transform_6(%arg0: i32) -> (i32, i32, i32) {
    %c0_i32 = arith.constant 0 : i32
    %c0_i32_0 = arith.constant 0 : i32
    %c0_i32_1 = arith.constant 0 : i32
    return %arg0, %c0_i32, %c0_i32_0 : i32, i32, i32
  }
}

</mosaic_0001>

<bundles_post_ra>
// kernel: custom-call.27
= control target key start
LH: loop header
LB: loop body
LE: loop exit
PB: predicated region body
PF: predicated region fallthrough
CT: control target
= control target key end

     0   :  { %5 = vsyncpa [#allocation4], 0  ;;  %s888_s0 = inlined_call_operand.vmem [shape: f32[2,8,8], index: 0, kind: input, shape index: {}]   ;;  %s889_s1 = inlined_call_operand.vmem [shape: f32[2,8,8], index: 1, kind: output, shape index: {0}]   ;;  %s890_s2 = inlined_call_operand.hbm [shape: s32[2,8], index: 2, kind: output, shape index: {1}]   ;;  %s891_s3 = inlined_call_operand.vmem [shape: s32[2,8], index: 3, kind: output, shape index: {2}]  }
   0x1   :  { %7 = vsyncpa [#allocation4 + $0x1], 0  ;;  %s707_s12 = smov 0   ;;  %s709_s13 = smov 0  }
   0x2   :  { %s711_s14 = smov 0   ;;  %s713_s15 = smov 0  }
   0x3 LB: > { %s728_s16 = sadd.s32 4294967295, %s679_s15   ;;  %s542_s17 = sadd.s32 4294967294, %s679_s15   ;;  %s679_s15 = sphi %s713_s15, %s899_s15   ;;  %s675_s14 = sphi %s711_s14, %s898_s14   ;;  %s671_s13 = sphi %s709_s13, %s897_s13   ;;  %s667_s12 = sphi %s707_s12, %s896_s12  }
   0x4   : > { %s732_s18 = sadd.s32 1, %s679_s15   ;;  %s17_s19 = sshrl.u32 %s679_s15, 3 }
   0x5   : > { %s18_s20 = sshrl.u32 %s732_s18, 3  ;;  %s22_s21 = sadd.s32 1, %s675_s14 }
   0x6   : > { %s19_s22 = ssub.s32 %s17_s19, %s18_s20  ;;  %p32_p0 = scmp.ne.s32.totalorder %s675_s14, %s671_s13 }
   0x7   : > { %p20_p1 = scmp.eq.s32.totalorder %s19_s22, 0  ;;  %p33_p2 = scmp.eq.s32.totalorder %s728_s16, 1 }
   0x8   : > { %p38_p3 = scmp.ne.s32.totalorder %s671_s13, %s667_s12  ;;  %p39_p4 = scmp.eq.s32.totalorder %s542_s17, 1 }
   0x9   : > { %s743_s23 = scalar_select %p20_p1, %s675_s14, %s22_s21  }
   0xa   : > { %p745_p5 = por %p33_p2, %p32_p0  ;;  %p749_p6 = por %p39_p4, %p38_p3 }
   0xb   : > { %p544_p7 = scmp.ge.s32.totalorder %s679_s15, 2 }
   0xc   : > { %s85_s26 = sand.u32 (!%p544_p7), 1, %s679_s15   ;;  %s546_s27 = sshll.u32 (!%p544_p7), %s679_s15, 3 }
   0xd   : > { %83 = sbr.rel (%p544_p7) target bundleno = 20 (0x14), region = 16  ;;  %s545_s28 = sshll.u32 (!%p544_p7), %s85_s26, 3 }
   0xe   : > { %s89_s4 = scalar_lea.vmem (!%p544_p7), %s888_s0, %s546_s27  ;;  %s87_s5 = scalar_lea.vmem (!%p544_p7), [#allocation0], %s545_s28 }
   0xf   : > { %v117_v0 = vld [vmem:[%s89_s4] sm:$0xff] (!%p544_p7) }
  0x10   : > { %118 = vst [vmem:[%s87_s5] sm:$0xff] (!%p544_p7), %v117_v0 }
  0x14 PF: > { %p547_p8 = scmp.ge.s32.totalorder %s679_s15, 1  ;;  %p123_p9 = scmp.lt.s32.totalorder %s679_s15, 3 }
  0x16   : > { %p124_p10 = pnand %p547_p8, %p123_p9 }
  0x18   : > { %127 = sbr.rel (%p124_p10) target bundleno = 441 (0x1b9), region = 54 }
  0x1f   : > { %s130_s6 = sand.u32 1, %s728_s16   ;;  %s145_s7 = sand.u32 1, %s671_s13   ;;  %v163_v1 = vlaneseq  ;;  %v685_v4 = vmov 0  }
  0x20   : > { %s548_s8 = sshll.u32 %s130_s6, 3  ;;  %s767_s9 = sshll.u32 %s145_s7, 1 }
  0x21   : > { %v770_v2 = vshrl.u32 %v163_v1, 7  ;;  %s132_s10 = scalar_lea.vmem [#allocation0], %s548_s8  ;;  %s772_s11 = scalar_lea.vmem [#allocation1], %s548_s8 }
  0x22   : > { %v156_v3 = vld [vmem:[%s132_s10] sm:$0xff]  ;;  %s158_s17 = sand.u32 7, %s728_s16   ;;  %s147_s20 = scalar_lea.vmem [#allocation3], %s767_s9 }
  0x23   : > { %157 = vst [vmem:[%s772_s11] sm:$0xff] %v156_v3  ;;  %167 = vst [vmem:[#allocation7] sm:$0xff] %v770_v2  ;;  %s777_s19 = scalar_lea.vmem [#allocation2], %s158_s17  ;;  %s153_s21 = scalar_lea.vmem [#allocation6], %s767_s9 }
  0x24   : > { %162 = vst [vmem:[%s777_s19] sm:$0x1] %v685_v4  ;;  %s782_s22 = scalar_lea.vmem [#allocation5], %s158_s17  ;;  %s784_s26 = smov 0  }
  0x25 LB: >> { %v791_v7 = vstv %s683_s26  ;;  %s224_s27 = ssub.s32 128, %s683_s26  ;;  %v230_v37 = vand.u32 127, %v163_v1  ;;  %s236_s28 = scalar_lea.vmem %s772_s11, %s683_s26 [#allocation1]  ;;  %s683_s26 = sphi %s784_s26, %s173_s26  }
  0x26   : >> { %vm182_vm0 = vcmp.ge.s32.totalorder %v770_v2, %v791_v7  ;;  %s242_s30 = scalar_lea.vmem [#allocation7], %s683_s26  ;;  %vm262_vm13 = vcmp.gt.s32.totalorder %v770_v2, %v791_v7  ;;  %s173_s26 = sadd.s32 1, %s683_s26  }
  0x27   : >> { %vm254_vm10 = vcmp.gt.s32.totalorder %v230_v37, %v791_v7  ;;  %vm231_vm11 = vcmp.eq.s32.totalorder %v230_v37, %v791_v7  ;;  %p170_p11 = scmp.ge.s32.totalorder %s173_s26, 8  }
  0x28   : >> { %vm266_vm15 = vmand %vm262_vm13, %vm231_vm11  ;;  %s892_s6 = sshrl.u32 (%p170_p11), %s728_s16, 3  ;;  %s556_s8 = sshll.u32 (%p170_p11), %s728_s16, 3 }
  0x29   : > { %s557_s10 = sshll.u32 (%p170_p11), %s892_s6, 5  ;;  %s686_s6 = smov (%p170_p11), [#allocation3]  }
  0x2a   : >> { %v178_v5 = vld [vmem:[%s772_s11] sm:$0xff]  ;;  %v238_v40 = vld [vmem:[%s236_s28] ss:$0 sm:$0xff]  ;;  %s617_s17 = sshll.u32 (%p170_p11), %s686_s6, 4  ;;  %s618_s17 = int_to_ptr.vmem [resolvable:$false] %s617_s17 }
  0x2b   : >> { %v179_v6 = vand.u32 2147483647, %v178_v5  ;;  %v233_v39 = vld [vmem:[%s777_s19] ss:$0 sm:$0xff] }
  0x2c   : >> { %v244_v41 = vld [vmem:[%s242_s30] ss:$0 sm:$0xff] }
  0x2d   : >> { %vm552_vm1 = vcmp.gt.f32.partialorder %v179_v6, -inf }
  0x2e   : >> { %vm186_vm2 = vmand %vm182_vm0, %vm552_vm1 }
  0x2f   : >> { %v187_v8 = vsel %vm186_vm2, %v770_v2, %v791_v7  ;;  %v188_v9 = vsel %vm186_vm2, %v179_v6, -inf }
  0x30   : >> { %v189_v10 = vrot.slane %v188_v9, 1  ;;  %v190_v11 = vrot.slane %v187_v8, 1 }
  0x32   : >> { %vm191_vm3 = vcmp.ge.f32.partialorder %v189_v10, %v188_v9  ;;  %v194_v12 = vrot.slane %v189_v10, 1  ;;  %v195_v13 = vrot.slane %v190_v11, 1 }
  0x33   : >> { %v192_v14 = vsel %vm191_vm3, %v189_v10, %v188_v9  ;;  %v193_v15 = vsel %vm191_vm3, %v190_v11, %v187_v8 }
  0x34   : >> { %vm196_vm4 = vcmp.ge.f32.partialorder %v194_v12, %v192_v14  ;;  %v199_v16 = vrot.slane %v194_v12, 1  ;;  %v200_v17 = vrot.slane %v195_v13, 1 }
  0x35   : >> { %v197_v18 = vsel %vm196_vm4, %v194_v12, %v192_v14  ;;  %v198_v19 = vsel %vm196_vm4, %v195_v13, %v193_v15 }
  0x36   : >> { %vm201_vm5 = vcmp.ge.f32.partialorder %v199_v16, %v197_v18  ;;  %v204_v20 = vrot.slane %v199_v16, 1  ;;  %v205_v21 = vrot.slane %v200_v17, 1 }
  0x37   : >> { %v202_v22 = vsel %vm201_vm5, %v199_v16, %v197_v18  ;;  %v203_v23 = vsel %vm201_vm5, %v200_v17, %v198_v19 }
  0x38   : >> { %vm206_vm6 = vcmp.ge.f32.partialorder %v204_v20, %v202_v22  ;;  %v209_v24 = vrot.slane %v204_v20, 1  ;;  %v210_v25 = vrot.slane %v205_v21, 1 }
  0x39   : >> { %v207_v26 = vsel %vm206_vm6, %v204_v20, %v202_v22  ;;  %v208_v27 = vsel %vm206_vm6, %v205_v21, %v203_v23 }
  0x3a   : >> { %vm211_vm7 = vcmp.ge.f32.partialorder %v209_v24, %v207_v26  ;;  %v214_v28 = vrot.slane %v209_v24, 1  ;;  %v215_v29 = vrot.slane %v210_v25, 1 }
  0x3b   : >> { %v212_v30 = vsel %vm211_vm7, %v209_v24, %v207_v26  ;;  %v213_v31 = vsel %vm211_vm7, %v210_v25, %v208_v27 }
  0x3c   : >> { %vm216_vm8 = vcmp.ge.f32.partialorder %v214_v28, %v212_v30  ;;  %v219_v32 = vrot.slane %v214_v28, 1  ;;  %v220_v33 = vrot.slane %v215_v29, 1 }
  0x3d   : >> { %v217_v34 = vsel %vm216_vm8, %v214_v28, %v212_v30  ;;  %v218_v35 = vsel %vm216_vm8, %v215_v29, %v213_v31 }
  0x3e   : >> { %vm221_vm9 = vcmp.ge.f32.partialorder %v219_v32, %v217_v34 }
  0x3f   : >> { %v223_v36 = vsel %vm221_vm9, %v220_v33, %v218_v35 }
  0x40   : >> { %225 = vrot.lane.b32.xlu0 %v223_v36, %s224_s27 }
  0xb2   : >> { %v226_v38 = vpop.permute.xlu0 %225 }
  0xb3   : >> { %561 = vpush %v226_v38 }
  0xe4   : >> { %s562_s29 = spop %561 }
  0xe5   : >> { %v232_v42 = vstv %s562_s29  ;;  %s237_s4 = scalar_lea.vmem %s772_s11, %s562_s29 [#allocation1]  ;;  %s243_s5 = scalar_lea.vmem [#allocation7], %s562_s29 }
  0xe6   : >> { %v239_v43 = vld [vmem:[%s237_s4] ss:$0 sm:$0xff]  ;;  %v234_v45 = vsel %vm231_vm11, %v232_v42, %v233_v39  ;;  %s835_s29 = scalar_lea.hbm (%p170_p11), %s890_s2, %s557_s10 }
  0xe7   : >> { %v245_v44 = vld [vmem:[%s243_s5] ss:$0 sm:$0xff]  ;;  %240 = vst [vmem:[%s237_s4] sm:$0x1] %v238_v40  ;;  %vm248_vm12 = vcmp.ne.f32.partialorder %v239_v43, 0.0  ;;  %235 = vst [vmem:[%s777_s19] sm:$0x1] %v234_v45  ;;  %v255_v52 = vsel %vm254_vm10, %v239_v43, 0.0  ;;  %s348_s19 = scalar_lea.vmem (%p170_p11), %s889_s1, %s556_s8 }
  0xe8   : >> { %246 = vst [vmem:[%s243_s5] sm:$0x1] %v244_v41  ;;  %241 = vst [vmem:[%s236_s28] sm:$0x1] %v239_v43  ;;  %s339_s4 = scalar_lea.sflag (%p170_p11), [#allocation4], %s145_s7 }
  0xe9   : >> { %247 = vst [vmem:[%s242_s30] sm:$0x1] %v245_v44  ;;  %vm249_vm14 = vmand %vm231_vm11, %vm248_vm12  ;;  %s391_s30 = sshll.u32 (%p170_p11), %s147_s20, 4  ;;  %s392_s30 = int_to_ptr.vmem [resolvable:$true] %s391_s30 }
  0xea   : >> { %v250_v46 = vsel %vm249_vm14, %v239_v43, 1.0  ;;  %s613_s5 = scalar_lea.vmem (%p170_p11), %s392_s30, 32  ;;  %p620_p1 = scmp.lt.s32.totalorder (%p170_p11), %s392_s30, %s618_s17 }
  0xeb   : >> { %v263_v47 = vsel %vm262_vm13, %v250_v46, 1.0  ;;  %p614_p12 = scmp.ne.s32.totalorder (%p170_p11), %s392_s30, %s613_s5 }
  0xec   : >> { %611 = vrcp.f32 %v263_v47 }
  0xed   : > { %p615_p13 = pnand (%p170_p11), %p614_p12, %p745_p5 }
  0xee   : > { %v325_v57 = vld [vmem:[#allocation2] sm:$0x3] (%p170_p11) }
  0xef   : >> { %v259_v49 = vld [vmem:[%s772_s11] sm:$0xff]  ;;  %327 = vst [vmem:[%s147_s20] sm:$0x3] (%p170_p11), %v325_v57  ;;  %p616_p0 = pneg (%p170_p11), %p615_p13 }
  0xf0   : > { %v273_v56 = vld [vmem:[#allocation7] sm:$0xff] (%p170_p11) }
  0xf6   : >> { %v612_v48 = vpop.eup %611 }
  0xf7   : >> { %v265_v50 = vmul.f32 %v612_v48, %v259_v49 }
  0xf9   : >> { %v267_v51 = vsel %vm266_vm15, %v265_v50, 0.0 }
  0xfa   : >> { %268 = vadd.xlane.f32.xlu0 %v267_v51 }
 0x127   : > { %289 = vxpose.xlu0.b32.start.end [1/1] (short) (narrow) (%p170_p11), %v273_v56, 8 }
 0x186   : > { %172 = sbr.rel (!%p170_p11) target bundleno = 37 (0x25), region = 210 }
 0x187   : >> { %v269_v53 = vpop.xlane.xlu0 %268 }
 0x188   : >> { %v270_v54 = vmul.f32 %v269_v53, %v255_v52 }
 0x18a   : >> { %v271_v55 = vsub.f32 %v265_v50, %v270_v54 }
 0x18c   : >> { %272 = vst [vmem:[%s772_s11] sm:$0xff] %v271_v55 }
 0x193   : > { %v376_v58 = vld [vmem:[%s772_s11] sm:$0xff]  ;;  %s619_s11 = scalar_lea.vmem %s618_s17, 64 }
 0x194   : > { %377 = vst [vmem:[%s348_s19] sm:$0xff] %v376_v58  ;;  %p621_p2 = scmp.lt.s32.totalorder %s619_s11, %s613_s5 }
 0x196   : > { %p622_p3 = por %p621_p2, %p620_p1 }
 0x198   : > { %p623_p4 = pnand %p622_p3, %p616_p0 }
 0x19a   : > { %626 = shalt.err (!%p623_p4)
}
 0x19b   : > { %s627_s7 = scalar_lea.hbm %s835_s29, 32  ;;  %s631_s6 = scalar_lea.hbm %s890_s2, 32 }
 0x19c   : > { %p628_p8 = scmp.ne.s32.totalorder %s835_s29, %s627_s7  ;;  %p632_p11 = scmp.lt.u32.totalorder %s835_s29, %s890_s2 }
 0x19d   : > { %p633_p12 = scmp.lt.u32.totalorder %s631_s6, %s627_s7  ;;  %p635_p0 = scmp.lt.u32.totalorder %s627_s7, %s835_s29 }
 0x19e   : > { %p629_p9 = pnand %p628_p8, %p745_p5 }
 0x19f   : > { %p634_p13 = por %p633_p12, %p632_p11 }
 0x1a0   : > { %p630_p10 = pneg %p629_p9 }
 0x1a1   : > { %p636_p1 = por %p635_p0, %p634_p13 }
 0x1a3   : > { %p637_p2 = pnand %p636_p1, %p630_p10 }
 0x1a5   : > { %640 = shalt.err (!%p637_p2)
}
 0x1a6   : > { %563 = dma.vmem_to_hbm [thread:$0]  (%p745_p5), %s392_s30, 32, %s835_s29, %s339_s4  }
 0x1a7   : > { %v305_v59 = vpop.trf.xlu0  ;;  %s895_s19 = sshrl.u32 (%p745_p5), %s728_s16, 3 }
 0x1a8   : > { %321 = vst [vmem:[%s782_s22] sm:$0x1] %v305_v59  ;;  %s558_s27 = sshll.u32 (%p745_p5), %s895_s19, 1 }
 0x1a9   : > { %s400_s17 = scalar_lea.vmem (%p745_p5), %s891_s3, %s558_s27 }
 0x1aa   : > { %397 = sbr.rel (!%p745_p5) target bundleno = 441 (0x1b9), region = 104 }
 0x1af   : > { %v331_v60 = vld [vmem:[#allocation5] sm:$0x3] }
 0x1b0   : > { %333 = vst [vmem:[%s153_s21] sm:$0x3] %v331_v60 }
 0x1b7   : > { %v416_v61 = vld [vmem:[%s153_s21] sm:$0x3] }
 0x1b8   : > { %417 = vst [vmem:[%s400_s17] sm:$0x3] %v416_v61 }
 0x1b9 PF: > { %s444_s22 = sand.u32 1, %s667_s12   ;;  %p566_p5 = pnand %p544_p7, %p749_p6 }
 0x1ba   : > { %s445_s24 = scalar_lea.sflag [#allocation4], %s444_s22 }
 0x1bb   : > { %662 = dma.done.wait (!%p566_p5), %s445_s24, 32  }
 0x1bc   : > { %664 = vsyncadd (!%p566_p5), %s445_s24, 4294967264  ;;  %p10_p3 = scmp.ge.s32.totalorder %s732_s18, 4   ;;  %s896_s12 = smov %s671_s13 }
 0x1bd   : > { %s897_s13 = smov %s675_s14  ;;  %s898_s14 = smov %s743_s23 }
 0x1be   : > { %s899_s15 = smov %s732_s18  ;;  %12 = sbr.rel (!%p10_p3) target bundleno = 3 (0x3), region = 221 }
 0x1c5   :  { %457 = vsyncpa [#allocation4], 1 }
 0x1c6   :  { %459 = vsyncpa [#allocation4 + $0x1], 1 }

// kernel: custom-call.29
= control target key start
LH: loop header
LB: loop body
LE: loop exit
PB: predicated region body
PF: predicated region fallthrough
CT: control target
= control target key end

     0   :  { %s385_s6 = smov 0   ;;  %s387_s7 = smov 0   ;;  %s443_s0 = inlined_call_operand.vmem [shape: f32[2,1,8,8], index: 0, kind: input, shape index: {}]   ;;  %s444_s1 = inlined_call_operand.vmem [shape: f32[2,1,8,8], index: 1, kind: output, shape index: {}]  }
   0x1   :  { %s389_s8 = smov 0  }
   0x2 LB: > { %s311_s9 = sadd.s32 4294967295, %s372_s8   ;;  %s33_s10 = sadd.s32 1, %s368_s7  ;;  %s372_s8 = sphi %s389_s8, %s7_s8   ;;  %s368_s7 = sphi %s387_s7, %s446_s7   ;;  %s364_s6 = sphi %s385_s6, %s445_s6  }
   0x3   : > { %p35_p0 = scmp.ge.s32.totalorder %s33_s10, 2  ;;  %p313_p1 = scmp.ge.s32.totalorder %s372_s8, 2 }
   0x4   : > { %s49_s11 = sand.u32 (!%p313_p1), 1, %s372_s8   ;;  %s315_s12 = sshll.u32 (!%p313_p1), %s368_s7, 3 }
   0x5   : > { %s448_s10 = smov (%p35_p0, %s33_s10), 0  ;;  %47 = sbr.rel (%p313_p1) target bundleno = 12 (0xc), region = 16 }
   0x6   : > { %s314_s13 = sshll.u32 (!%p313_p1), %s49_s11, 3  ;;  %s56_s16 = scalar_lea.vmem (!%p313_p1), %s443_s0, %s315_s12 }
   0x7   : > { %v84_v0 = vld [vmem:[%s56_s16] sm:$0xff] (!%p313_p1)  ;;  %s51_s17 = scalar_lea.vmem (!%p313_p1), [#allocation0], %s314_s13 }
   0x8   : > { %85 = vst [vmem:[%s51_s17] sm:$0xff] (!%p313_p1), %v84_v0 }
   0xc PF: > { %p316_p2 = scmp.ge.s32.totalorder %s372_s8, 1  ;;  %p90_p3 = scmp.lt.s32.totalorder %s372_s8, 3 }
   0xe   : > { %p91_p4 = pnand %p316_p2, %p90_p3 }
  0x10   : > { %94 = sbr.rel (%p91_p4) target bundleno = 1213 (0x4bd), region = 54 }
  0x17   : > { %s97_s18 = sand.u32 1, %s311_s9   ;;  %v108_v1 = vlaneseq  ;;  %v374_v10 = vmov -1.0   ;;  %s320_s21 = sshll.u32 %s364_s6, 3 }
  0x18   : > { %s317_s19 = sshll.u32 %s97_s18, 3  ;;  %s219_s24 = scalar_lea.vmem %s444_s1, %s320_s21 }
  0x19   : > { %v412_v2 = vand.u32 127, %v108_v1  ;;  %v112_v3 = vshrl.u32 %v108_v1, 7  ;;  %s99_s20 = scalar_lea.vmem [#allocation0], %s317_s19 }
  0x1a   : > { %v115_v4 = vld [vmem:[%s99_s20] sm:$0xff] }
  0x1b   : > { %vm110_vm0 = vcmp.lt.s32.totalorder %v412_v2, 8  ;;  %vm114_vm1 = vcmp.eq.s32.totalorder %v112_v3, %v412_v2  ;;  %vm119_vm2 = vcmp.ge.s32.totalorder %v112_v3, %v412_v2  ;;  %vm133_vm4 = vcmp.eq.s32.totalorder %v412_v2, 0 }
  0x1c   : > { %v116_v5 = vsel %vm114_vm1, %v115_v4, 0.0  ;;  %vm120_vm3 = vmand %vm119_vm2, %vm110_vm0  ;;  %vm130_vm5 = vcmp.eq.s32.totalorder %v412_v2, %v112_v3  ;;  %v134_v11 = vsel %vm133_vm4, 1.0, %v374_v10  ;;  %vm141_vm6 = vcmp.eq.s32.totalorder %v412_v2, 1 }
  0x1d   : > { %v121_v6 = vsel %vm120_vm3, %v115_v4, 0.0  ;;  %117 = vadd.xlane.f32.xlu0 %v116_v5  ;;  %v135_v12 = vsel %vm130_vm5, %v134_v11, 0.0  ;;  %vm151_vm7 = vcmp.eq.s32.totalorder %v412_v2, 2  ;;  %vm161_vm8 = vcmp.eq.s32.totalorder %v412_v2, 3 }
  0x1e   : > { %vm171_vm9 = vcmp.eq.s32.totalorder %v412_v2, 4  ;;  %vm181_vm10 = vcmp.eq.s32.totalorder %v412_v2, 5  ;;  %vm191_vm11 = vcmp.eq.s32.totalorder %v412_v2, 6  ;;  %vm201_vm12 = vcmp.eq.s32.totalorder %v412_v2, 7 }
  0xaa   : > { %v417_v7 = vpop.xlane.xlu0 %117 }
  0xab   : > { %348 = vrcp.f32 %v417_v7  ;;  %vm208_vm13 = vweird.f32 %v417_v7 }
  0xb5   : > { %v349_v8 = vpop.eup %348 }
  0xb6   : > { %v123_v9 = vmul.f32 %v349_v8, %v121_v6 }
  0xb8   : > { %124 = vst [vmem:[#allocation2] sm:$0xff] %v123_v9 }
  0xbf   : > { %v137_v13 = vld [vmem:[#allocation2 + $0x1] ss:$0 sm:$0xff]  ;;  %v147_v16 = vld [vmem:[#allocation2 + $0x2] ss:$0 sm:$0xff]  ;;  %v157_v21 = vld [vmem:[#allocation2 + $0x3] ss:$0 sm:$0xff] }
  0xc0   : > { %v138_v14 = vxor.u32 2147483648, %v137_v13  ;;  %v148_v18 = vxor.u32 2147483648, %v147_v16  ;;  %v158_v23 = vxor.u32 2147483648, %v157_v21  ;;  %v167_v26 = vld [vmem:[#allocation2 + $0x4] ss:$0 sm:$0xff] }
  0xc1   : > { %v168_v28 = vxor.u32 2147483648, %v167_v26  ;;  %v177_v31 = vld [vmem:[#allocation2 + $0x5] ss:$0 sm:$0xff]  ;;  %v187_v36 = vld [vmem:[#allocation2 + $0x6] ss:$0 sm:$0xff] }
  0xc2   : > { %v142_v15 = vmul.f32 %v138_v14, %v135_v12  ;;  %v178_v33 = vxor.u32 2147483648, %v177_v31  ;;  %v188_v38 = vxor.u32 2147483648, %v187_v36  ;;  %v197_v41 = vld [vmem:[#allocation2 + $0x7] ss:$0 sm:$0xff] }
  0xc3   : > { %v198_v43 = vxor.u32 2147483648, %v197_v41 }
  0xc4   : > { %143 = vadd.xlane.f32.xlu0 %v142_v15 }
 0x151   : > { %v144_v17 = vpop.xlane.xlu0 %143 }
 0x152   : > { %v145_v19 = vsel %vm141_vm6, %v144_v17, %v135_v12 }
 0x153   : > { %v152_v20 = vmul.f32 %v148_v18, %v145_v19 }
 0x155   : > { %153 = vadd.xlane.f32.xlu1 %v152_v20 }
 0x1e2   : > { %v154_v22 = vpop.xlane.xlu1 %153 }
 0x1e3   : > { %v155_v24 = vsel %vm151_vm7, %v154_v22, %v145_v19 }
 0x1e4   : > { %v162_v25 = vmul.f32 %v158_v23, %v155_v24 }
 0x1e6   : > { %163 = vadd.xlane.f32.xlu1 %v162_v25 }
 0x273   : > { %v164_v27 = vpop.xlane.xlu1 %163 }
 0x274   : > { %v165_v29 = vsel %vm161_vm8, %v164_v27, %v155_v24 }
 0x275   : > { %v172_v30 = vmul.f32 %v168_v28, %v165_v29 }
 0x277   : > { %173 = vadd.xlane.f32.xlu0 %v172_v30 }
 0x304   : > { %v174_v32 = vpop.xlane.xlu0 %173 }
 0x305   : > { %v175_v34 = vsel %vm171_vm9, %v174_v32, %v165_v29 }
 0x306   : > { %v182_v35 = vmul.f32 %v178_v33, %v175_v34 }
 0x308   : > { %183 = vadd.xlane.f32.xlu1 %v182_v35 }
 0x395   : > { %v184_v37 = vpop.xlane.xlu1 %183 }
 0x396   : > { %v185_v39 = vsel %vm181_vm10, %v184_v37, %v175_v34 }
 0x397   : > { %v192_v40 = vmul.f32 %v188_v38, %v185_v39 }
 0x399   : > { %193 = vadd.xlane.f32.xlu0 %v192_v40 }
 0x426   : > { %v194_v42 = vpop.xlane.xlu0 %193 }
 0x427   : > { %v195_v44 = vsel %vm191_vm11, %v194_v42, %v185_v39 }
 0x428   : > { %v202_v45 = vmul.f32 %v198_v43, %v195_v44 }
 0x42a   : > { %203 = vadd.xlane.f32.xlu1 %v202_v45 }
 0x4b7   : > { %v204_v46 = vpop.xlane.xlu1 %203 }
 0x4b8   : > { %v205_v47 = vsel %vm201_vm12, %v204_v46, %v195_v44 }
 0x4b9   : > { %v207_v48 = vmul.f32 %v349_v8, %v205_v47 }
 0x4bb   : > { %v209_v49 = vsel %vm208_vm13, %v205_v47, %v207_v48 }
 0x4bc   : > { %248 = vst [vmem:[%s219_s24] sm:$0xff] %v209_v49 }
 0x4bd PF: > { %s7_s8 = sadd.s32 1, %s372_s8   ;;  %s445_s6 = smov %s368_s7 }
 0x4be   : > { %p4_p5 = scmp.ge.s32.totalorder %s7_s8, 4   ;;  %s446_s7 = smov %s448_s10 }
 0x4c0   :  { %6 = sbr.rel (!%p4_p5) target bundleno = 2 (0x2), region = 125 }

// kernel: custom-call.28
= control target key start
LH: loop header
LB: loop body
LE: loop exit
PB: predicated region body
PF: predicated region fallthrough
CT: control target
= control target key end

     0   :  { %s384_s6 = smov 0   ;;  %s386_s7 = smov 0   ;;  %s442_s0 = inlined_call_operand.vmem [shape: f32[2,1,8,8], index: 0, kind: input, shape index: {}]   ;;  %s443_s1 = inlined_call_operand.vmem [shape: f32[2,1,8,8], index: 1, kind: output, shape index: {}]  }
   0x1   :  { %s388_s8 = smov 0  }
   0x2 LB: > { %s310_s9 = sadd.s32 4294967295, %s371_s8   ;;  %s33_s10 = sadd.s32 1, %s367_s7  ;;  %s371_s8 = sphi %s388_s8, %s7_s8   ;;  %s367_s7 = sphi %s386_s7, %s445_s7   ;;  %s363_s6 = sphi %s384_s6, %s444_s6  }
   0x3   : > { %p35_p0 = scmp.ge.s32.totalorder %s33_s10, 2  ;;  %p312_p1 = scmp.ge.s32.totalorder %s371_s8, 2 }
   0x4   : > { %s49_s11 = sand.u32 (!%p312_p1), 1, %s371_s8   ;;  %s314_s12 = sshll.u32 (!%p312_p1), %s367_s7, 3 }
   0x5   : > { %s447_s10 = smov (%p35_p0, %s33_s10), 0  ;;  %47 = sbr.rel (%p312_p1) target bundleno = 12 (0xc), region = 16 }
   0x6   : > { %s313_s13 = sshll.u32 (!%p312_p1), %s49_s11, 3  ;;  %s56_s16 = scalar_lea.vmem (!%p312_p1), %s442_s0, %s314_s12 }
   0x7   : > { %v84_v0 = vld [vmem:[%s56_s16] sm:$0xff] (!%p312_p1)  ;;  %s51_s17 = scalar_lea.vmem (!%p312_p1), [#allocation0], %s313_s13 }
   0x8   : > { %85 = vst [vmem:[%s51_s17] sm:$0xff] (!%p312_p1), %v84_v0 }
   0xc PF: > { %p315_p2 = scmp.ge.s32.totalorder %s371_s8, 1  ;;  %p90_p3 = scmp.lt.s32.totalorder %s371_s8, 3 }
   0xe   : > { %p91_p4 = pnand %p315_p2, %p90_p3 }
  0x10   : > { %94 = sbr.rel (%p91_p4) target bundleno = 1213 (0x4bd), region = 54 }
  0x17   : > { %s97_s18 = sand.u32 1, %s310_s9   ;;  %v108_v1 = vlaneseq  ;;  %v373_v10 = vmov -1.0   ;;  %s319_s21 = sshll.u32 %s363_s6, 3 }
  0x18   : > { %s316_s19 = sshll.u32 %s97_s18, 3  ;;  %s218_s24 = scalar_lea.vmem %s443_s1, %s319_s21 }
  0x19   : > { %v411_v2 = vand.u32 127, %v108_v1  ;;  %v112_v3 = vshrl.u32 %v108_v1, 7  ;;  %s99_s20 = scalar_lea.vmem [#allocation0], %s316_s19 }
  0x1a   : > { %v115_v4 = vld [vmem:[%s99_s20] sm:$0xff] }
  0x1b   : > { %vm110_vm0 = vcmp.lt.s32.totalorder %v411_v2, 8  ;;  %vm114_vm1 = vcmp.eq.s32.totalorder %v112_v3, %v411_v2  ;;  %vm119_vm2 = vcmp.le.s32.totalorder %v112_v3, %v411_v2  ;;  %vm133_vm4 = vcmp.eq.s32.totalorder %v411_v2, 7 }
  0x1c   : > { %v116_v5 = vsel %vm114_vm1, %v115_v4, 0.0  ;;  %vm120_vm3 = vmand %vm119_vm2, %vm110_vm0  ;;  %vm130_vm5 = vcmp.eq.s32.totalorder %v411_v2, %v112_v3  ;;  %v134_v11 = vsel %vm133_vm4, 1.0, %v373_v10  ;;  %vm141_vm6 = vcmp.eq.s32.totalorder %v411_v2, 6 }
  0x1d   : > { %v121_v6 = vsel %vm120_vm3, %v115_v4, 0.0  ;;  %117 = vadd.xlane.f32.xlu0 %v116_v5  ;;  %v135_v12 = vsel %vm130_vm5, %v134_v11, 0.0  ;;  %vm151_vm7 = vcmp.eq.s32.totalorder %v411_v2, 5  ;;  %vm161_vm8 = vcmp.eq.s32.totalorder %v411_v2, 4 }
  0x1e   : > { %vm171_vm9 = vcmp.eq.s32.totalorder %v411_v2, 3  ;;  %vm181_vm10 = vcmp.eq.s32.totalorder %v411_v2, 2  ;;  %vm191_vm11 = vcmp.eq.s32.totalorder %v411_v2, 1  ;;  %vm200_vm12 = vcmp.eq.s32.totalorder %v411_v2, 0 }
  0xaa   : > { %v416_v7 = vpop.xlane.xlu0 %117 }
  0xab   : > { %347 = vrcp.f32 %v416_v7  ;;  %vm207_vm13 = vweird.f32 %v416_v7 }
  0xb5   : > { %v348_v8 = vpop.eup %347 }
  0xb6   : > { %v123_v9 = vmul.f32 %v348_v8, %v121_v6 }
  0xb8   : > { %124 = vst [vmem:[#allocation2] sm:$0xff] %v123_v9 }
  0xbf   : > { %v137_v13 = vld [vmem:[#allocation2 + $0x6] ss:$0 sm:$0xff]  ;;  %v147_v16 = vld [vmem:[#allocation2 + $0x5] ss:$0 sm:$0xff]  ;;  %v157_v21 = vld [vmem:[#allocation2 + $0x4] ss:$0 sm:$0xff] }
  0xc0   : > { %v138_v14 = vxor.u32 2147483648, %v137_v13  ;;  %v148_v18 = vxor.u32 2147483648, %v147_v16  ;;  %v158_v23 = vxor.u32 2147483648, %v157_v21  ;;  %v167_v26 = vld [vmem:[#allocation2 + $0x3] ss:$0 sm:$0xff] }
  0xc1   : > { %v168_v28 = vxor.u32 2147483648, %v167_v26  ;;  %v177_v31 = vld [vmem:[#allocation2 + $0x2] ss:$0 sm:$0xff]  ;;  %v187_v36 = vld [vmem:[#allocation2 + $0x1] ss:$0 sm:$0xff] }
  0xc2   : > { %v142_v15 = vmul.f32 %v138_v14, %v135_v12  ;;  %v178_v33 = vxor.u32 2147483648, %v177_v31  ;;  %v188_v38 = vxor.u32 2147483648, %v187_v36  ;;  %v196_v41 = vld [vmem:[#allocation2] ss:$0 sm:$0xff] }
  0xc3   : > { %v197_v43 = vxor.u32 2147483648, %v196_v41 }
  0xc4   : > { %143 = vadd.xlane.f32.xlu0 %v142_v15 }
 0x151   : > { %v144_v17 = vpop.xlane.xlu0 %143 }
 0x152   : > { %v145_v19 = vsel %vm141_vm6, %v144_v17, %v135_v12 }
 0x153   : > { %v152_v20 = vmul.f32 %v148_v18, %v145_v19 }
 0x155   : > { %153 = vadd.xlane.f32.xlu1 %v152_v20 }
 0x1e2   : > { %v154_v22 = vpop.xlane.xlu1 %153 }
 0x1e3   : > { %v155_v24 = vsel %vm151_vm7, %v154_v22, %v145_v19 }
 0x1e4   : > { %v162_v25 = vmul.f32 %v158_v23, %v155_v24 }
 0x1e6   : > { %163 = vadd.xlane.f32.xlu1 %v162_v25 }
 0x273   : > { %v164_v27 = vpop.xlane.xlu1 %163 }
 0x274   : > { %v165_v29 = vsel %vm161_vm8, %v164_v27, %v155_v24 }
 0x275   : > { %v172_v30 = vmul.f32 %v168_v28, %v165_v29 }
 0x277   : > { %173 = vadd.xlane.f32.xlu0 %v172_v30 }
 0x304   : > { %v174_v32 = vpop.xlane.xlu0 %173 }
 0x305   : > { %v175_v34 = vsel %vm171_vm9, %v174_v32, %v165_v29 }
 0x306   : > { %v182_v35 = vmul.f32 %v178_v33, %v175_v34 }
 0x308   : > { %183 = vadd.xlane.f32.xlu1 %v182_v35 }
 0x395   : > { %v184_v37 = vpop.xlane.xlu1 %183 }
 0x396   : > { %v185_v39 = vsel %vm181_vm10, %v184_v37, %v175_v34 }
 0x397   : > { %v192_v40 = vmul.f32 %v188_v38, %v185_v39 }
 0x399   : > { %193 = vadd.xlane.f32.xlu0 %v192_v40 }
 0x426   : > { %v194_v42 = vpop.xlane.xlu0 %193 }
 0x427   : > { %v195_v44 = vsel %vm191_vm11, %v194_v42, %v185_v39 }
 0x428   : > { %v201_v45 = vmul.f32 %v197_v43, %v195_v44 }
 0x42a   : > { %202 = vadd.xlane.f32.xlu1 %v201_v45 }
 0x4b7   : > { %v203_v46 = vpop.xlane.xlu1 %202 }
 0x4b8   : > { %v204_v47 = vsel %vm200_vm12, %v203_v46, %v195_v44 }
 0x4b9   : > { %v206_v48 = vmul.f32 %v348_v8, %v204_v47 }
 0x4bb   : > { %v208_v49 = vsel %vm207_vm13, %v204_v47, %v206_v48 }
 0x4bc   : > { %247 = vst [vmem:[%s218_s24] sm:$0xff] %v208_v49 }
 0x4bd PF: > { %s7_s8 = sadd.s32 1, %s371_s8   ;;  %s444_s6 = smov %s367_s7 }
 0x4be   : > { %p4_p5 = scmp.ge.s32.totalorder %s7_s8, 4   ;;  %s445_s7 = smov %s447_s10 }
 0x4c0   :  { %6 = sbr.rel (!%p4_p5) target bundleno = 2 (0x2), region = 124 }

// kernel: tree_inference.5
= control target key start
LH: loop header
LB: loop body
LE: loop exit
PB: predicated region body
PF: predicated region fallthrough
CT: control target
= control target key end

     0   :  { %s408_s18 = smov 0   ;;  %s445_s0 = inlined_call_operand.vmem [shape: f32[2,8,32], index: 0, kind: input, shape index: {}]   ;;  %s446_s1 = inlined_call_operand.vmem [shape: f32[8,32], index: 1, kind: input, shape index: {}]   ;;  %s447_s2 = inlined_call_operand.vmem [shape: f32[1,32], index: 2, kind: input, shape index: {}]   ;;  %s448_s3 = inlined_call_operand.vmem [shape: f32[1,32], index: 3, kind: input, shape index: {}]   ;;  %s449_s4 = inlined_call_operand.vmem [shape: f32[2,8,1], index: 4, kind: input, shape index: {}]   ;;  %s450_s5 = inlined_call_operand.vmem [shape: f32[2,8,32], index: 5, kind: output, shape index: {}]  }
   0x1 LB: > { %s344_s19 = sadd.s32 4294967295, %s375_s18   ;;  %p348_p0 = scmp.ge.s32.totalorder %s375_s18, 1  ;;  %s375_s18 = sphi %s408_s18, %s15_s18  }
   0x2   : > { %p195_p1 = scmp.lt.s32.totalorder %s375_s18, 3 }
   0x4   : > { %p196_p2 = pnand %p348_p0, %p195_p1 }
   0x5   : > { %p225_p3 = scmp.lt.s32.totalorder (!%p196_p2), %s344_s19, 1  ;;  %v238_v0 = vld [vmem:[%s446_s1] sm:$0xff] (!%p196_p2)  ;;  %vm240_vm0 = vcmask (!%p196_p2), 261120   ;;  %v377_v4 = vmov (!%p196_p2), 0  }
   0x6   : > { %199 = sbr.rel (%p196_p2) target bundleno = 335 (0x14f), region = 40  ;;  %365 = vset.pattern.permute.xlu1 (!%p196_p2), %v377_v4  ;;  %366 = vset.pattern.permute.xlu0 (!%p196_p2), %v377_v4  ;;  %v352_v15 = vld [vmem:[%s447_s2] ss:$0 sm:$0xff] (!%p196_p2) }
   0x7   : > { %v353_v17 = vld [vmem:[%s448_s3] ss:$0 sm:$0xff] (!%p196_p2) }
   0xd   : > { %s452_s19 = smov (!%p225_p3, %s344_s19), 1 }
   0xe   : > { %s416_s20 = sshll.u32 %s452_s19, 3 }
   0xf   : > { %s228_s25 = scalar_lea.vmem %s445_s0, %s416_s20  ;;  %s232_s28 = scalar_lea.vmem %s449_s4, %s416_s20 }
  0x10   : > { %v237_v1 = vld [vmem:[%s228_s25] sm:$0xff]  ;;  %s236_s10 = scalar_lea.vmem %s450_s5, %s416_s20 }
  0x11   : > { %v239_v2 = vadd.f32 %v238_v0, %v237_v1  ;;  %v271_v5 = vld [vmem:[%s232_s28] sm:$0xff] }
  0x12   : > { %274 = vperm.xlu1 %365, %v271_v5  }
  0x13   : > { %v241_v3 = vsel %vm240_vm0, %v239_v2, 0.0 }
  0x14   : > { %242 = vadd.xlane.f32.xlu0 %v241_v3 }
  0x91   : > { %v275_v19 = vpop.permute.xlu1 %274 }
  0xa1   : > { %v243_v6 = vpop.xlane.xlu0 %242 }
  0xa2   : > { %v245_v7 = vmul.f32 0.03125, %v243_v6 }
  0xa4   : > { %v246_v8 = vsub.f32 %v239_v2, %v245_v7 }
  0xa6   : > { %v247_v9 = vmul.f32 %v246_v8, %v246_v8 }
  0xa8   : > { %v248_v10 = vsel %vm240_vm0, %v247_v9, 0.0 }
  0xa9   : > { %249 = vadd.xlane.f32.xlu0 %v248_v10 }
 0x136   : > { %v250_v11 = vpop.xlane.xlu0 %249 }
 0x137   : > { %v251_v12 = vmul.f32 0.03125, %v250_v11 }
 0x139   : > { %v252_v13 = vadd.f32 1e-06, %v251_v12 }
 0x13b   : > { %367 = vrsqrt.f32 %v252_v13 }
 0x145   : > { %v368_v14 = vpop.eup %367 }
 0x146   : > { %v254_v16 = vmul.f32 %v368_v14, %v246_v8 }
 0x148   : > { %v262_v18 = vmul.f32 %v352_v15, %v254_v16 }
 0x14a   : > { %v270_v20 = vadd.f32 %v353_v17, %v262_v18 }
 0x14c   : > { %v277_v21 = vmul.f32 %v275_v19, %v270_v20 }
 0x14e   : > { %278 = vst.msk [vmem:[%s236_s10] sm:$0xff] %vm240_vm0, %v277_v21 }
 0x14f PF: > { %s15_s18 = sadd.s32 1, %s375_s18  }
 0x150   : > { %p12_p4 = scmp.ge.s32.totalorder %s15_s18, 4  }
 0x152   :  { %14 = sbr.rel (!%p12_p4) target bundleno = 1 (0x1), region = 73 }

// kernel: tree_inference.8
= control target key start
LH: loop header
LB: loop body
LE: loop exit
PB: predicated region body
PF: predicated region fallthrough
CT: control target
= control target key end

     0   :  { %s1182_s19 = smov 0   ;;  %s1271_s0 = inlined_call_operand.vmem [shape: f32[2,8,32], index: 0, kind: input, shape index: {}]   ;;  %s1272_s1 = inlined_call_operand.vmem [shape: f32[32,32], index: 1, kind: input, shape index: {}]   ;;  %s1273_s2 = inlined_call_operand.vmem [shape: f32[1,32], index: 2, kind: input, shape index: {}]   ;;  %s1274_s3 = inlined_call_operand.vmem [shape: f32[32,32], index: 3, kind: input, shape index: {}]   ;;  %s1275_s4 = inlined_call_operand.vmem [shape: f32[1,32], index: 4, kind: input, shape index: {}]   ;;  %s1276_s5 = inlined_call_operand.vmem [shape: f32[1,32], index: 5, kind: input, shape index: {}]   ;;  %s1277_s6 = inlined_call_operand.<no memory space> [shape: f32[1,1], index: 6, kind: input, shape index: {}]   ;;  %s1278_s7 = inlined_call_operand.vmem [shape: f32[2,1,8], index: 7, kind: input, shape index: {}]   ;;  %s1279_s8 = inlined_call_operand.vmem [shape: f32[2,8,1], index: 8, kind: input, shape index: {}]   ;;  %s1280_s9 = inlined_call_operand.vmem [shape: f32[2,8,8], index: 9, kind: output, shape index: {0}]   ;;  %s1281_s10 = inlined_call_operand.vmem [shape: f32[2,8,8], index: 10, kind: output, shape index: {1}]   ;;  %s1282_s11 = inlined_call_operand.vmem [shape: f32[2,1,8], index: 11, kind: output, shape index: {2}]  }
   0x1   :  { %v17_v0 = vstv %s1277_s6 }
   0x2   :  { %18 = vst [vmem:[#allocation2] sm:$0x1] %v17_v0 }
   0x3 LB: > { %s1008_s20 = sadd.s32 4294967295, %s1113_s19   ;;  %p1012_p0 = scmp.ge.s32.totalorder %s1113_s19, 1  ;;  %s1113_s19 = sphi %s1182_s19, %s24_s19  }
   0x4   : > { %p360_p1 = scmp.lt.s32.totalorder %s1113_s19, 3 }
   0x6   : > { %p361_p2 = pnand %p1012_p0, %p360_p1 }
   0x7   : > { %v435_v1 = vld [vmem:[%s1272_s1] sm:$0xff] (!%p361_p2)  ;;  %v436_v2 = vld [vmem:[%s1272_s1 + $0x8] sm:$0xff] (!%p361_p2)  ;;  %v1115_v4 = vmov (!%p361_p2), 0.0|0.0   ;;  %v437_v7 = vld [vmem:[%s1272_s1 + $0x10] sm:$0xff] (!%p361_p2)  ;;  %p412_p3 = scmp.lt.s32.totalorder (!%p361_p2), %s1008_s20, 1  ;;  %vm1116_vm0 = vmmov (!%p361_p2), 0   ;;  %v607_v30 = vlaneseq (!%p361_p2) }
   0x8   : > { %364 = sbr.rel (%p361_p2) target bundleno = 473 (0x1d9), region = 56  ;;  %v521_v3 = vld [vmem:[%s1274_s3] sm:$0xff] (!%p361_p2)  ;;  %1082 = vmatprep.subr.bf16.mxu0 (!%p361_p2), %v1115_v4  ;;  %1088 = vmatprep.subr.bf16.mxu1 (!%p361_p2), %v1115_v4  ;;  %v1083_v5 = vpack.c.bf16 (!%p361_p2), %v436_v2, %v435_v1  ;;  %v522_v6 = vld [vmem:[%s1274_s3 + $0x8] sm:$0xff] (!%p361_p2)  ;;  %v438_v8 = vld [vmem:[%s1272_s1 + $0x18] sm:$0xff] (!%p361_p2)  ;;  %v1117_v12 = vmov (!%p361_p2), 0.0   ;;  %vm446_vm1 = vcmask (!%p361_p2), 261120  }
   0x9   : > { %v1089_v9 = vpack.c.bf16 (!%p361_p2), %v522_v6, %v521_v3  ;;  %v523_v10 = vld [vmem:[%s1274_s3 + $0x10] sm:$0xff] (!%p361_p2)  ;;  %v524_v11 = vld [vmem:[%s1274_s3 + $0x18] sm:$0xff] (!%p361_p2)  ;;  %1053 = vmatprep.mubr.msk.f32.mxu0 (!%p361_p2), %vm1116_vm0, %v1117_v12  ;;  %1064 = vmatprep.mubr.msk.f32.mxu1 (!%p361_p2), %vm1116_vm0, %v1117_v12  ;;  %v1086_v13 = vpack.c.bf16 (!%p361_p2), %v438_v8, %v437_v7  ;;  %v1118_v16 = vmov (!%p361_p2), 0   ;;  %v769_v19 = vld [vmem:[#allocation2] sm:$0x1] (!%p361_p2)  ;;  %v608_v31 = vshrl.u32 (!%p361_p2), %v607_v30, 7 }
   0xa   : > { %1084 = vmatpush3.bf16.msra.mxu0 (!%p361_p2), %v1083_v5  ;;  %v1092_v14 = vpack.c.bf16 (!%p361_p2), %v524_v11, %v523_v10  ;;  %1106 = vset.pattern.permute.xlu0 (!%p361_p2), %v1118_v16  ;;  %v1017_v20 = vld [vmem:[%s1273_s2] ss:$0 sm:$0xff] (!%p361_p2)  ;;  %vm859_vm2 = vcmask (!%p361_p2), 64512   ;;  %vm876_vm3 = vcmask (!%p361_p2), 57344   ;;  %v857_v59 = vand.u32 (!%p361_p2), 127, %v607_v30 }
   0xb   : > { %1090 = vmatpush3.bf16.msra.mxu1 (!%p361_p2), %v1089_v9  ;;  %1085 = vmatprep.subr.bf16.mxu0 (!%p361_p2), %v1115_v4  ;;  %v1019_v21 = vld [vmem:[%s1275_s4] ss:$0 sm:$0xff] (!%p361_p2)  ;;  %v609_v34 = vsub.s32 (!%p361_p2), 0, %v608_v31 }
   0xc   : > { %1091 = vmatprep.subr.bf16.mxu1 (!%p361_p2), %v1115_v4  ;;  %v768_v29 = vld [vmem:[%s1276_s5] sm:$0x1] (!%p361_p2)  ;;  %vm858_vm4 = vcmp.eq.s32.totalorder (!%p361_p2), %v608_v31, %v857_v59 }
   0xe   : > { %1087 = vmatpush3.bf16.msra.mxu0 (!%p361_p2), %v1086_v13 }
   0xf   : > { %s1284_s20 = smov (!%p412_p3, %s1008_s20), 1  ;;  %1093 = vmatpush3.bf16.msra.mxu1 %v1092_v14  ;;  %1067 = vmatprep.subr.mxu0 %v1117_v12 }
  0x10   : > { %s1219_s17 = sshll.u32 %s1284_s20, 3  ;;  %1072 = vmatprep.subr.mxu1 %v1117_v12  ;;  %s418_s14 = scalar_lea.vmem %s1278_s7, %s1284_s20 }
  0x11   : > { %s415_s22 = scalar_lea.vmem %s1271_s0, %s1219_s17  ;;  %s422_s24 = scalar_lea.vmem %s1279_s8, %s1219_s17  ;;  %v602_v32 = vld [vmem:[%s418_s14] sm:$0x1] }
  0x12   : > { %v434_v15 = vld [vmem:[%s415_s22] sm:$0xff]  ;;  %v604_v33 = vmul.f32 50.0, %v602_v32  ;;  %s426_s18 = scalar_lea.vmem %s1280_s9, %s1219_s17  ;;  %s433_s6 = scalar_lea.vmem %s1282_s11, %s1284_s20 }
  0x13   : > { %1054 = vmatmul.mubr.msk.f32.vlgmr.msra.gmra.mrb[0].mxu0 %vm446_vm1, %v434_v15  ;;  %1065 = vmatmul.mubr.msk.f32.vlgmr.msra.gmra.mrb[0].mxu1 %vm446_vm1, %v434_v15  ;;  %v603_v17 = vld [vmem:[%s422_s24] sm:$0xff]  ;;  %s430_s25 = scalar_lea.vmem %s1281_s10, %s1219_s17 }
  0x14   : > { %1069 = vmatprep.mubr.msk.f32.mxu0 %vm1116_vm0, %v1117_v12  ;;  %1074 = vmatprep.mubr.msk.f32.mxu1 %vm1116_vm0, %v1117_v12  ;;  %v605_v18 = vmul.f32 50.0, %v603_v17  ;;  %v610_v35 = vrot.slane %v604_v33, %v609_v34 }
  0x16   : > { %614 = vperm.xlu0 %1106, %v605_v18  }
  0x1a   : > { %772 = vperm.xlu0 %1106, %v769_v19  }
  0x95   : > { %v615_v36 = vpop.permute.xlu0 %614 }
  0x96   : > { %v617_v37 = vadd.f32 %v615_v36, %v610_v35 }
  0x99   : > { %v773_v38 = vpop.permute.xlu0 %772 }
  0x9a   : > { %v778_v45 = vrot.slane %v773_v38, %v609_v34 }
  0xe6   : > { %v516_v22 = vpop.f32.mrb[0].mxu0  ;;  %v598_v24 = vpop.f32.mrb[0].mxu1 }
  0xe7   : > { %v517_v23 = vadd.f32 %v1017_v20, %v516_v22  ;;  %v1055_v25 = vpop.f32.mrb[1].mxu0  ;;  %v599_v26 = vadd.f32 %v1019_v21, %v598_v24  ;;  %v1066_v27 = vpop.f32.mrb[1].mxu1 }
  0xe9   : > { %v520_v28 = vmul.f32 0.17677669, %v517_v23  ;;  %1068 = vmatpush3.xpose.msk.msra.mxu0 %vm446_vm1, %v599_v26 }
  0xea   : > { %1077 = vmatprep.subr.mxu0 %v1117_v12 }
  0xeb   : > { %1073 = vmatpush3.xpose.msk.msra.mxu1 %vm446_vm1, %v520_v28 }
  0xec   : > { %1070 = vmatmul.mubr.msk.f32.vlgmr.msra.gmra.mrb[2].mxu0 %vm446_vm1, %v520_v28 }
  0xed   : > { %1078 = vmatpush3.xpose.msk.msra.mxu0 %vm446_vm1, %v434_v15  ;;  %1079 = vmatprep.mubr.msk.f32.mxu0 %vm1116_vm0, %v1117_v12 }
  0xee   : > { %1075 = vmatmul.mubr.msk.f32.vlgmr.msra.gmra.mrb[2].mxu1 %vm446_vm1, %v599_v26 }
  0xf0   : > { %1080 = vmatmul.mubr.msk.f32.vlgmr.msra.gmra.mrb[4].mxu0 %vm446_vm1, %v768_v29 }
 0x1bf   : > { %v690_v39 = vpop.f32.mrb[2].mxu0 }
 0x1c0   : > { %v694_v40 = vsub.f32 %v690_v39, %v617_v37  ;;  %v1071_v41 = vpop.f32.mrb[3].mxu0 }
 0x1c1   : > { %v762_v42 = vpop.f32.mrb[2].mxu1 }
 0x1c2   : > { %v766_v43 = vsub.f32 %v762_v42, %v617_v37  ;;  %v1076_v44 = vpop.f32.mrb[3].mxu1  ;;  %v695_v46 = vmax.f32 %v694_v40, -40.0 }
 0x1c3   : > { %v848_v48 = vpop.f32.mrb[4].mxu0 }
 0x1c4   : > { %v767_v47 = vmax.f32 %v766_v43, -40.0  ;;  %v860_v49 = vsel %vm859_vm2, %v695_v46, 0.0  ;;  %v849_v50 = vadd.f32 %v848_v48, %v778_v45  ;;  %v1081_v51 = vpop.f32.mrb[5].mxu0 }
 0x1c5   : > { %v861_v52 = vrot.slane %v860_v49, 4 }
 0x1c6   : > { %874 = vst.msk [vmem:[%s426_s18] sm:$0xff] %vm859_vm2, %v767_v47  ;;  %v852_v53 = vsub.f32 %v849_v50, %v604_v33 }
 0x1c7   : > { %v862_v54 = vadd.f32 %v861_v52, %v860_v49 }
 0x1c8   : > { %v853_v55 = vmax.f32 %v852_v53, -40.0 }
 0x1c9   : > { %v863_v56 = vrot.slane %v862_v54, 2 }
 0x1ca   : > { %877 = vst.msk [vmem:[%s433_s6] sm:$0x1] %vm876_vm3, %v853_v55 }
 0x1cb   : > { %v864_v57 = vadd.f32 %v863_v56, %v862_v54 }
 0x1cd   : > { %v865_v58 = vrot.slane %v864_v57, 1 }
 0x1cf   : > { %v866_v60 = vadd.f32 %v865_v58, %v864_v57 }
 0x1d1   : > { %v867_v61 = vadd.f32 %v866_v60, %v853_v55 }
 0x1d3   : > { %v871_v62 = vrot.slane %v867_v61, %v609_v34 }
 0x1d5   : > { %v872_v63 = vsel %vm858_vm4, %v871_v62, 0.0 }
 0x1d6   : > { %v873_v0 = vsub.f32 %v872_v63, %v695_v46 }
 0x1d8   : > { %875 = vst.msk [vmem:[%s430_s25] sm:$0xff] %vm859_vm2, %v873_v0 }
 0x1d9 PF: > { %s24_s19 = sadd.s32 1, %s1113_s19  }
 0x1da   : > { %p21_p4 = scmp.ge.s32.totalorder %s24_s19, 4  }
 0x1dc   :  { %23 = sbr.rel (!%p21_p4) target bundleno = 3 (0x3), region = 116 }

// kernel: tree_inference.9
= control target key start
LH: loop header
LB: loop body
LE: loop exit
PB: predicated region body
PF: predicated region fallthrough
CT: control target
= control target key end

     0   :  { %12 = vsyncpa [#allocation3], 0  ;;  %s984_s0 = inlined_call_operand.vmem [shape: f32[2,8,8], index: 0, kind: input, shape index: {}]   ;;  %s985_s1 = inlined_call_operand.vmem [shape: f32[2,8,8], index: 1, kind: input, shape index: {}]   ;;  %s986_s2 = inlined_call_operand.vmem [shape: f32[2,1,8], index: 2, kind: input, shape index: {}]   ;;  %s987_s3 = inlined_call_operand.vmem [shape: f32[2,1,8], index: 3, kind: input, shape index: {}]   ;;  %s988_s4 = inlined_call_operand.hbm [shape: f32[2,8,8], index: 4, kind: output, shape index: {0}]   ;;  %s989_s5 = inlined_call_operand.hbm [shape: f32[2,8,8], index: 5, kind: output, shape index: {1}]   ;;  %s990_s6 = inlined_call_operand.hbm [shape: f32[2,1,8], index: 6, kind: output, shape index: {2}]  }
   0x1   :  { %14 = vsyncpa [#allocation3 + $0x1], 0 }
   0x2   :  { %15 = vsyncpa [#allocation5], 0 }
   0x3   :  { %17 = vsyncpa [#allocation5 + $0x1], 0  ;;  %s783_s21 = smov 0   ;;  %s785_s22 = smov 0  }
   0x4   :  { %s787_s23 = smov 0   ;;  %s789_s24 = smov 0  }
   0x5 LB: > { %s804_s25 = sadd.s32 4294967295, %s742_s24   ;;  %s991_s26 = sadd.s32 4294967294, %s742_s24   ;;  %s742_s24 = sphi %s789_s24, %s998_s24   ;;  %s738_s23 = sphi %s787_s23, %s997_s23   ;;  %s734_s22 = sphi %s785_s22, %s996_s22   ;;  %s730_s21 = sphi %s783_s21, %s995_s21  }
   0x6   : > { %s808_s27 = sadd.s32 1, %s742_s24   ;;  %s134_s28 = sadd.s32 1, %s738_s23 }
   0x7   : > { %s131_s29 = ssub.s32 %s742_s24, %s808_s27  ;;  %p144_p0 = scmp.ne.s32.totalorder %s738_s23, %s734_s22 }
   0x8   : > { %p132_p1 = scmp.eq.s32.totalorder %s131_s29, 0  ;;  %p145_p2 = scmp.eq.s32.totalorder %s804_s25, 1 }
   0x9   : > { %p150_p3 = scmp.ne.s32.totalorder %s734_s22, %s730_s21  ;;  %p151_p4 = scmp.eq.s32.totalorder %s991_s26, 1 }
   0xa   : > { %s821_s30 = scalar_select %p132_p1, %s738_s23, %s134_s28  }
   0xb   : > { %p823_p5 = por %p145_p2, %p144_p0  ;;  %p827_p6 = por %p151_p4, %p150_p3 }
   0xc   : > { %p555_p7 = scmp.ge.s32.totalorder %s742_s24, 1  ;;  %p247_p8 = scmp.lt.s32.totalorder %s742_s24, 3 }
   0xe   : > { %p248_p9 = pnand %p555_p7, %p247_p8 }
   0xf   : > { %p295_p10 = scmp.lt.s32.totalorder (!%p248_p9), %s804_s25, 1  ;;  %v313_v0 = vlaneseq (!%p248_p9)  ;;  %v744_v3 = vmov (!%p248_p9), 0.0   ;;  %vm321_vm1 = vcmask (!%p248_p9), 64512   ;;  %vm355_vm2 = vcmask (!%p248_p9), 57344   ;;  %s851_s20 = sand.u32 (!%p248_p9), 1, %s734_s22  }
  0x10   : > { %251 = sbr.rel (%p248_p9) target bundleno = 256 (0x100), region = 36  ;;  %s294_s28 = scalar_lea.vmem (!%p248_p9), [#allocation6], %s851_s20 }
  0x11   : > { %v314_v1 = vshrl.u32 (!%p248_p9), %v313_v0, 7  ;;  %v316_v2 = vand.u32 (!%p248_p9), 127, %v313_v0  ;;  %s745_s29 = smov (!%p248_p9), [#allocation2]  }
  0x12   : > { %s624_s11 = sshll.u32 (!%p248_p9), %s745_s29, 4  ;;  %s625_s11 = int_to_ptr.vmem [resolvable:$false] %s624_s11 }
  0x13   : > { %vm317_vm0 = vcmp.eq.s32.totalorder (!%p248_p9), %v314_v1, %v316_v2  ;;  %v338_v10 = vsub.s32 (!%p248_p9), 0, %v314_v1 }
  0x14   : > { %v560_v4 = vsel (!%p248_p9), %vm317_vm0, 1.0, %v744_v3 }
  0x17   : > { %s835_s9 = scalar_select %p295_p10, %s804_s25, 1 }
  0x19   : > { %s558_s10 = sshll.u32 %s835_s9, 3  ;;  %s308_s16 = scalar_lea.vmem %s987_s3, %s835_s9 }
  0x1a   : > { %s302_s13 = scalar_lea.vmem %s985_s1, %s558_s10  ;;  %v312_v8 = vld [vmem:[%s308_s16] sm:$0x1]  ;;  %s305_s19 = scalar_lea.vmem %s986_s2, %s835_s9 }
  0x1b   : > { %v310_v5 = vld [vmem:[%s302_s13] sm:$0xff]  ;;  %v334_v9 = vsub.f32 1.0, %v312_v8  ;;  %s298_s12 = scalar_lea.vmem %s984_s0, %s558_s10  ;;  %s556_s9 = sshll.u32 %s851_s20, 3 }
  0x1c   : > { %v320_v6 = vmul.f32 %v560_v4, %v310_v5  ;;  %v311_v18 = vld [vmem:[%s305_s19] sm:$0x1]  ;;  %s563_s13 = sshll.u32 %s804_s25, 7  ;;  %s281_s14 = scalar_lea.vmem [#allocation2], %s556_s9 }
  0x1d   : > { %v339_v11 = vrot.slane %v334_v9, %v338_v10  ;;  %v309_v20 = vld [vmem:[%s298_s12] sm:$0xff]  ;;  %s380_s15 = sshll.u32 %s281_s14, 4  ;;  %s868_s18 = scalar_lea.hbm %s988_s4, %s563_s13  ;;  %s870_s15 = int_to_ptr.vmem [resolvable:$true] %s380_s15 }
  0x1e   : > { %v322_v7 = vsel %vm321_vm1, %v320_v6, 0.0  ;;  %s358_s10 = scalar_lea.sflag [#allocation3], %s851_s20  ;;  %s620_s19 = scalar_lea.vmem %s870_s15, 128 }
  0x1f   : > { %329 = vadd.xlane.f32.xlu0 %v322_v7  ;;  %v323_v12 = vrot.slane %v322_v7, 4  ;;  %p621_p11 = scmp.ne.s32.totalorder %s870_s15, %s620_s19  ;;  %s626_s12 = scalar_lea.vmem %s625_s11, 256 }
  0x20   : > { %p627_p0 = scmp.lt.s32.totalorder %s870_s15, %s625_s11  ;;  %p628_p1 = scmp.lt.s32.totalorder %s626_s12, %s620_s19 }
  0x21   : > { %v324_v13 = vadd.f32 %v323_v12, %v322_v7  ;;  %p622_p12 = pnand %p621_p11, %p823_p5 }
  0x22   : > { %p629_p2 = por %p628_p1, %p627_p0 }
  0x23   : > { %v325_v14 = vrot.slane %v324_v13, 2  ;;  %p623_p13 = pneg %p622_p12 }
  0x25   : > { %v326_v15 = vadd.f32 %v325_v14, %v324_v13  ;;  %p630_p3 = pnand %p629_p2, %p623_p13 }
  0x27   : > { %v327_v16 = vrot.slane %v326_v15, 1 }
  0x29   : > { %v328_v17 = vadd.f32 %v327_v16, %v326_v15 }
  0x2b   : > { %v331_v19 = vmul.f32 %v328_v17, %v311_v18 }
  0x2d   : > { %356 = vst.msk [vmem:[%s294_s28] sm:$0x1] %vm355_vm2, %v331_v19 }
  0xac   : > { %v330_v21 = vpop.xlane.xlu0 %329 }
  0xad   : > { %v332_v22 = vsub.f32 %v330_v21, %v310_v5 }
  0xaf   : > { %v333_v23 = vmul.f32 %v332_v22, %v309_v20 }
  0xb1   : > { %v341_v24 = vmul.f32 %v339_v11, %v333_v23 }
  0xb3   : > { %v342_v25 = vmul.f32 %v341_v24, %v341_v24  ;;  %352 = vst.msk [vmem:[%s281_s14] sm:$0xff] %vm321_vm1, %v341_v24 }
  0xb4   : > { %633 = shalt.err (!%p630_p3)
}
  0xb5   : > { %s634_s14 = scalar_lea.hbm %s868_s18, 128  ;;  %s638_s29 = scalar_lea.hbm %s988_s4, 256 }
  0xb6   : > { %p635_p4 = scmp.ne.s32.totalorder %s868_s18, %s634_s14  ;;  %p639_p9 = scmp.lt.u32.totalorder %s868_s18, %s988_s4 }
  0xb7   : > { %p640_p10 = scmp.lt.u32.totalorder %s638_s29, %s634_s14  ;;  %p642_p12 = scmp.lt.u32.totalorder %s634_s14, %s868_s18 }
  0xb8   : > { %p636_p7 = pnand %p635_p4, %p823_p5 }
  0xb9   : > { %p641_p11 = por %p640_p10, %p639_p9 }
  0xba   : > { %p637_p8 = pneg %p636_p7 }
  0xbb   : > { %p643_p13 = por %p642_p12, %p641_p11 }
  0xbd   : > { %p644_p0 = pnand %p643_p13, %p637_p8 }
  0xbf   : > { %647 = shalt.err (!%p644_p0)
}
  0xc0   : > { %568 = dma.vmem_to_hbm [thread:$0]  (%p823_p5), %s870_s15, 128, %s868_s18, %s358_s10   ;;  %v343_v26 = vsel %vm321_vm1, %v342_v25, 0.0 }
  0xc1   : > { %v344_v27 = vrot.slane %v343_v26, 4  ;;  %s362_s26 = sand.u32 1, %s804_s25   ;;  %s288_s19 = scalar_lea.vmem [#allocation4], %s556_s9 }
  0xc2   : > { %s393_s12 = sshll.u32 %s288_s19, 4  ;;  %s565_s14 = sshll.u32 %s804_s25, 4  ;;  %s909_s12 = int_to_ptr.vmem [resolvable:$true] %s393_s12 }
  0xc3   : > { %v345_v28 = vadd.f32 %v344_v27, %v343_v26  ;;  %s406_s15 = sshll.u32 %s294_s28, 4  ;;  %s907_s16 = scalar_lea.hbm %s989_s5, %s563_s13  ;;  %s916_s15 = int_to_ptr.vmem [resolvable:$true] %s406_s15 }
  0xc4   : > { %s914_s9 = scalar_lea.hbm %s990_s6, %s565_s14  ;;  %s919_s25 = scalar_lea.sflag [#allocation5], %s362_s26 }
  0xc5   : > { %v346_v29 = vrot.slane %v345_v28, 2  ;;  %s648_s20 = scalar_lea.vmem %s909_s12, 128  ;;  %s746_s28 = smov [#allocation4]  }
  0xc6   : > { %p649_p1 = scmp.ne.s32.totalorder %s909_s12, %s648_s20  ;;  %s652_s13 = sshll.u32 %s746_s28, 4  ;;  %s653_s13 = int_to_ptr.vmem [resolvable:$false] %s652_s13 }
  0xc7   : > { %v347_v30 = vadd.f32 %v346_v29, %v345_v28  ;;  %s654_s11 = scalar_lea.vmem %s653_s13, 256  ;;  %p655_p4 = scmp.lt.s32.totalorder %s909_s12, %s653_s13 }
  0xc8   : > { %p650_p2 = pnand %p649_p1, %p823_p5  ;;  %p656_p7 = scmp.lt.s32.totalorder %s654_s11, %s648_s20 }
  0xc9   : > { %v348_v31 = vrot.slane %v347_v30, 1 }
  0xca   : > { %p651_p3 = pneg %p650_p2  ;;  %p657_p8 = por %p656_p7, %p655_p4 }
  0xcb   : > { %v349_v32 = vadd.f32 %v348_v31, %v347_v30 }
  0xcc   : > { %p658_p9 = pnand %p657_p8, %p651_p3 }
  0xcd   : > { %618 = vrsqrt.f32 %v349_v32 }
  0xd7   : > { %v619_v33 = vpop.eup %618 }
  0xd8   : > { %v351_v34 = vmin.f32 %v619_v33, 1e+12 }
  0xda   : > { %v353_v35 = vmul.f32 %v351_v34, %v341_v24 }
  0xdc   : > { %354 = vst.msk [vmem:[%s288_s19] sm:$0xff] %vm321_vm1, %v353_v35 }
  0xdd   : > { %661 = shalt.err (!%p658_p9)
}
  0xde   : > { %s662_s26 = scalar_lea.hbm %s907_s16, 128  ;;  %s666_s18 = scalar_lea.hbm %s989_s5, 256 }
  0xdf   : > { %p663_p10 = scmp.ne.s32.totalorder %s907_s16, %s662_s26  ;;  %p667_p13 = scmp.lt.u32.totalorder %s907_s16, %s989_s5 }
  0xe0   : > { %p668_p0 = scmp.lt.u32.totalorder %s666_s18, %s662_s26  ;;  %p670_p2 = scmp.lt.u32.totalorder %s662_s26, %s907_s16 }
  0xe1   : > { %p664_p11 = pnand %p663_p10, %p823_p5 }
  0xe2   : > { %p669_p1 = por %p668_p0, %p667_p13 }
  0xe3   : > { %p665_p12 = pneg %p664_p11 }
  0xe4   : > { %p671_p3 = por %p670_p2, %p669_p1 }
  0xe6   : > { %p672_p4 = pnand %p671_p3, %p665_p12 }
  0xe8   : > { %675 = shalt.err (!%p672_p4)
}
  0xe9   : > { %569 = dma.vmem_to_hbm [thread:$0]  (%p823_p5), %s909_s12, 128, %s907_s16, %s919_s25  }
  0xea   : > { %s676_s29 = scalar_lea.vmem %s916_s15, 16  ;;  %s747_s20 = smov [#allocation6]  }
  0xeb   : > { %p677_p7 = scmp.ne.s32.totalorder %s916_s15, %s676_s29  ;;  %s680_s28 = sshll.u32 %s747_s20, 4  ;;  %s681_s28 = int_to_ptr.vmem [resolvable:$false] %s680_s28 }
  0xec   : > { %s682_s13 = scalar_lea.vmem %s681_s28, 32  ;;  %p683_p10 = scmp.lt.s32.totalorder %s916_s15, %s681_s28 }
  0xed   : > { %p678_p8 = pnand %p677_p7, %p823_p5  ;;  %p684_p11 = scmp.lt.s32.totalorder %s682_s13, %s676_s29 }
  0xef   : > { %p679_p9 = pneg %p678_p8  ;;  %p685_p12 = por %p684_p11, %p683_p10 }
  0xf1   : > { %p686_p13 = pnand %p685_p12, %p679_p9 }
  0xf3   : > { %689 = shalt.err (!%p686_p13)
}
  0xf4   : > { %s690_s12 = scalar_lea.hbm %s914_s9, 16  ;;  %s694_s26 = scalar_lea.hbm %s990_s6, 32 }
  0xf5   : > { %p691_p0 = scmp.ne.s32.totalorder %s914_s9, %s690_s12  ;;  %p695_p3 = scmp.lt.u32.totalorder %s914_s9, %s990_s6 }
  0xf6   : > { %p696_p4 = scmp.lt.u32.totalorder %s694_s26, %s690_s12  ;;  %p698_p8 = scmp.lt.u32.totalorder %s690_s12, %s914_s9 }
  0xf7   : > { %p692_p1 = pnand %p691_p0, %p823_p5 }
  0xf8   : > { %p697_p7 = por %p696_p4, %p695_p3 }
  0xf9   : > { %p693_p2 = pneg %p692_p1 }
  0xfa   : > { %p699_p9 = por %p698_p8, %p697_p7 }
  0xfc   : > { %p700_p10 = pnand %p699_p9, %p693_p2 }
  0xfe   : > { %703 = shalt.err (!%p700_p10)
}
  0xff   : > { %570 = dma.vmem_to_hbm [thread:$0]  (%p823_p5), %s916_s15, 16, %s914_s9, %s919_s25  }
 0x100 PF: > { %p584_p11 = scmp.ge.s32.totalorder %s742_s24, 2  ;;  %s418_s18 = sand.u32 1, %s730_s21  }
 0x101   : > { %s419_s10 = scalar_lea.sflag [#allocation3], %s418_s18 }
 0x102   : > { %p575_p12 = pnand %p584_p11, %p827_p6 }
 0x104   : > { %721 = dma.done.wait (!%p575_p12), %s419_s10, 128  }
 0x105   : > { %723 = vsyncadd (!%p575_p12), %s419_s10, 4294967168  ;;  %s994_s17 = sadd.s32 4294967294, %s742_s24  }
 0x106   : > { %s427_s29 = sand.u32 1, %s994_s17  }
 0x107   : > { %s428_s20 = scalar_lea.sflag [#allocation5], %s427_s29 }
 0x108   : > { %725 = dma.done.wait (!%p575_p12), %s428_s20, 144  }
 0x109   : > { %727 = vsyncadd (!%p575_p12), %s428_s20, 4294967152  ;;  %p20_p5 = scmp.ge.s32.totalorder %s808_s27, 4   ;;  %s995_s21 = smov %s734_s22 }
 0x10a   : > { %s996_s22 = smov %s738_s23  ;;  %s997_s23 = smov %s821_s30 }
 0x10b   : > { %s998_s24 = smov %s808_s27  ;;  %22 = sbr.rel (!%p20_p5) target bundleno = 5 (0x5), region = 112 }
 0x112   :  { %441 = vsyncpa [#allocation3], 1 }
 0x113   :  { %443 = vsyncpa [#allocation3 + $0x1], 1 }
 0x114   :  { %444 = vsyncpa [#allocation5], 1 }
 0x115   :  { %446 = vsyncpa [#allocation5 + $0x1], 1 }

</bundles_post_ra>
